<compile_context>
chip_gen: v5e
topology: v5e:2x2
jax: 0.10.0
libtpu: 0.0.40
codegen_flags: <defaults>
</compile_context>

<pallas_src>
import jax
import jax.numpy as jnp
from jax.experimental import pallas as pl
from jax.experimental.pallas import tpu as pltpu


def _corr_kernel(p_ref, t_ref, corr_ref):
    """Per-(i, j) Pearson correlation over dim 0 for one (tile_c, tile_d) block."""
    n = p_ref.shape[0]
    inv_n = jnp.float32(1.0 / n)
    zeros = jnp.zeros(corr_ref.shape, jnp.float32)
    unroll = n <= 16  # small B: fully unroll so the LLO scheduler sees it all

    # Pass 1: sums over dim 0, one [tile_c, tile_d] slab at a time (no
    # block-sized f32 temporaries are ever live).
    def sum_body(b, carry):
        sp, st = carry
        return (sp + p_ref[b].astype(jnp.float32),
                st + t_ref[b].astype(jnp.float32))

    sp, st = jax.lax.fori_loop(0, n, sum_body, (zeros, zeros), unroll=unroll)
    pm = sp * inv_n
    tm = st * inv_n

    # Pass 2: centered second moments.  The block is VMEM-resident, so the
    # second read is cheap, and this matches the PyTorch mean-centered
    # reference (avoids catastrophic cancellation of the raw-moment form).
    def mom_body(b, carry):
        cov, vp, vt = carry
        pc = p_ref[b].astype(jnp.float32) - pm
        tc = t_ref[b].astype(jnp.float32) - tm
        return cov + pc * tc, vp + pc * pc, vt + tc * tc

    cov, vp, vt = jax.lax.fori_loop(0, n, mom_body, (zeros, zeros, zeros),
                                    unroll=unroll)

    # corr = cov / (std_p * std_t); the common 1/B normalization cancels.
    # Zero-variance columns give NaN, matching the PyTorch module (no eps).
    corr_ref[...] = cov * jax.lax.rsqrt(vp * vt)


def _round_up(x, m):
    return -(-x // m) * m


def _largest_aligned_divisor(n, unit, cap):
    """Largest t <= cap with t % unit == 0 and n % t == 0, else None."""
    t = min(cap, n)
    t -= t % unit
    while t >= unit:
        if n % t == 0:
            return t
        t -= unit
    return None


def batch_correlation_loss(preds, targets):
    """Pallas implementation of BatchCorrelationLoss.forward."""
    if preds.shape != targets.shape:
        raise ValueError(f"shape mismatch: {preds.shape} vs {targets.shape}")
    if preds.ndim != 3:
        raise ValueError(f"expected 3-D [B, C, D] inputs, got {preds.shape}")
    B, C, D = preds.shape
    if C < B:
        raise ValueError(
            "preds.shape[1] must be >= preds.shape[0]: the PyTorch loop "
            "indexes dim 1 with i in range(batch_size).")

    isz = jnp.dtype(preds.dtype).itemsize

    # ---- generation-aware VMEM budget --------------------------------------
    try:
        vmem_cap = int(pltpu.get_tpu_info().vmem_capacity_bytes)
    except Exception:  # conservative fallback if the query is unavailable
        vmem_cap = 64 << 20
    if vmem_cap <= (64 << 20):          # v7x-class TensorCore: 64 MiB VMEM
        vmem_limit_cap = 48 << 20
        tile_budget = 36 << 20
    else:                               # v5e / v6e: 128 MiB VMEM
        vmem_limit_cap = 96 << 20
        tile_budget = 80 << 20

    # Per (tile_c * tile_d) element cost: 2 inputs x 2 pipeline buffers of the
    # [B, tile_c, tile_d] block, plus ~12 tile-sized f32 accumulators / slab
    # temporaries inside the kernel and 2 output buffers.
    per_elem_bytes = 4 * B * isz + 14 * 4
    max_tile_elems = max(tile_budget // per_elem_bytes, 128)

    # ---- tile over dim 1 (the i-axis: first B of the C rows) ---------------
    if B % 8 == 0:
        tile_c = B
        while tile_c > 8 and max_tile_elems // tile_c < 128:
            smaller = _largest_aligned_divisor(B, 8, tile_c - 8)
            if smaller is None:
                break
            tile_c = smaller
        c_extent = B
    else:
        # Pad the single i-block up to a multiple of 8 (or to the full dim-1
        # extent if C is too short to pad).  The (< 8) extra rows are computed
        # and simply excluded from the final mean -- no wrapper HBM slice copy.
        padded = _round_up(B, 8)
        tile_c = padded if padded <= C else C      # full-dim block is legal
        c_extent = tile_c
    grid_c = c_extent // tile_c

    # ---- tile over dim 2 (lane axis) ----------------------------------------
    lane_cap = max(128, max_tile_elems // tile_c)
    if D <= lane_cap:
        tile_d = D                                 # fully contiguous rows
    else:
        tile_d = _largest_aligned_divisor(D, 128, lane_cap)
        if tile_d is None:
            # No 128-aligned divisor fits the budget: use a 128-aligned
            # non-divisor tile with a cdiv grid; the boundary block's
            # out-of-range lanes are dropped on store, so the result is exact.
            tile_d = max(128, (lane_cap // 128) * 128)
    grid_d = pl.cdiv(D, tile_d)

    # Keep >= 3 grid steps for large problems so the BlockSpec pipeline can
    # overlap DMA with compute and v7x can shard the parallel axes across both
    # TensorCores (costs only a couple of ~0.35us step overheads).
    big_enough = B * c_extent * D * isz >= (4 << 20)
    while big_enough and grid_c * grid_d < 3 and tile_d >= 256:
        tile_d = _round_up(-(-tile_d // 2), 128)   # halve, keep 128-aligned
        grid_d = pl.cdiv(D, tile_d)

    # ---- VMEM accounting -----------------------------------------------------
    block_in_bytes = B * tile_c * tile_d * isz
    tile_f32_bytes = tile_c * tile_d * 4
    vmem_need = (4 * block_in_bytes            # 2 inputs x double buffer
                 + 2 * tile_f32_bytes          # output double buffer
                 + 12 * tile_f32_bytes         # in-kernel accumulators / slabs
                 + (2 << 20))                  # compiler-internal headroom
    vmem_limit = int(min(max(vmem_need, 32 << 20), vmem_limit_cap))
    # TODO(synk): for extreme B (block over budget even at an 8x128 tile) a
    # masked reduction over dim 0 would be needed; unreachable for spec sizes.

    corr = pl.pallas_call(
        _corr_kernel,
        out_shape=jax.ShapeDtypeStruct((c_extent, D), jnp.float32),
        grid_spec=pltpu.PrefetchScalarGridSpec(
            num_scalar_prefetch=0,
            grid=(grid_c, grid_d),
            in_specs=[
                pl.BlockSpec((B, tile_c, tile_d), lambda ci, di: (0, ci, di)),
                pl.BlockSpec((B, tile_c, tile_d), lambda ci, di: (0, ci, di)),
            ],
            out_specs=pl.BlockSpec((tile_c, tile_d), lambda ci, di: (ci, di)),
        ),
        compiler_params=pltpu.CompilerParams(
            dimension_semantics=("parallel", "parallel"),
            vmem_limit_bytes=vmem_limit,
        ),
    )(preds, targets)

    # Tiny finalization: negative mean over the first B rows (rows >= B only
    # exist as 8-alignment padding and are excluded).
    return -jnp.mean(corr[:B, :])


def _reference_loss(preds, targets):
    """Pure-JAX reference mirroring the PyTorch double loop (vectorized)."""
    B = preds.shape[0]
    p = preds[:, :B, :].astype(jnp.float32)
    t = targets[:, :B, :].astype(jnp.float32)
    pm = jnp.mean(p, axis=0, keepdims=True)
    tm = jnp.mean(t, axis=0, keepdims=True)
    pc, tc = p - pm, t - tm
    num = jnp.mean(pc * tc, axis=0)
    ps = jnp.sqrt(jnp.mean(pc * pc, axis=0))
    ts = jnp.sqrt(jnp.mean(tc * tc, axis=0))
    return -jnp.mean(num / (ps * ts))


if __name__ == "__main__":
    key = jax.random.PRNGKey(0)

    # Small shapes consistent with the module ([B, C, D], C >= B):
    #   * aligned single-block case
    #   * C > B with tiny D (full-D block, no wrapper slice)
    #   * B not a multiple of 8 -> padded i-tile (8 rows, mean over first 6)
    #   * B not a multiple of 8 and C too short to pad -> full-C i-tile
    #   * large D -> multi-step pipelined grid along D
    #   * bf16 inputs kept narrow all the way into the kernel
    cases = [
        (16, 16, 256, jnp.float32),
        (8, 12, 48, jnp.float32),
        (6, 10, 16, jnp.float32),
        (6, 6, 32, jnp.float32),
        (8, 8, 16384, jnp.float32),
        (8, 8, 256, jnp.bfloat16),
    ]
    for idx, (B, C, D, dtype) in enumerate(cases):
        k1, k2, key = jax.random.split(key, 3)
        preds_f = jax.random.normal(k1, (B, C, D), dtype=jnp.float32)
        noise = jax.random.normal(k2, (B, C, D), dtype=jnp.float32)
        targets_f = 0.5 * preds_f + 0.5 * noise
        preds = preds_f.astype(dtype)
        targets = targets_f.astype(dtype)

        loss = jax.block_until_ready(batch_correlation_loss(preds, targets))
        ref = jax.block_until_ready(_reference_loss(preds, targets))
        assert jnp.allclose(loss, ref, atol=5e-5, rtol=5e-4), (idx, loss, ref)

    print("KERNEL_OK")
</pallas_src>

<mosaic_0001>
module attributes {stable_mosaic.version = 11 : i64} {
  func.func @_corr_kernel(%arg0: i32, %arg1: i32, %arg2: memref<16x16x256xf32, #tpu.memory_space<vmem>>, %arg3: memref<16x16x256xf32, #tpu.memory_space<vmem>>, %arg4: memref<16x256xf32, #tpu.memory_space<vmem>>) attributes {dimension_semantics = [#tpu.dimension_semantics<parallel>, #tpu.dimension_semantics<parallel>], iteration_bounds = array<i64: 1, 1>, scalar_prefetch = 0 : i64, scratch_operands = 0 : i64, tpu.core_type = #tpu.core_type<tc>, window_params = [{transform_indices = @transform_0, window_bounds = array<i64: 16, 16, 256>}, {transform_indices = @transform_1, window_bounds = array<i64: 16, 16, 256>}, {transform_indices = @transform_2, window_bounds = array<i64: 16, 256>}]} {
    %cst = arith.constant 0.000000e+00 : f32
    %0 = vector.broadcast %cst : f32 to vector<16x256xf32>
    %c0_i32 = arith.constant 0 : i32
    %1 = arith.index_cast %c0_i32 : i32 to index
    %c0 = arith.constant 0 : index
    %c0_0 = arith.constant 0 : index
    %2 = vector.load %arg2[%1, %c0, %c0_0] : memref<16x16x256xf32, #tpu.memory_space<vmem>>, vector<1x16x256xf32>
    %3 = vector.shape_cast %2 : vector<1x16x256xf32> to vector<16x256xf32>
    %4 = arith.addf %0, %3 : vector<16x256xf32>
    %5 = arith.index_cast %c0_i32 : i32 to index
    %c0_1 = arith.constant 0 : index
    %c0_2 = arith.constant 0 : index
    %6 = vector.load %arg3[%5, %c0_1, %c0_2] : memref<16x16x256xf32, #tpu.memory_space<vmem>>, vector<1x16x256xf32>
    %7 = vector.shape_cast %6 : vector<1x16x256xf32> to vector<16x256xf32>
    %8 = arith.addf %0, %7 : vector<16x256xf32>
    %c1_i32 = arith.constant 1 : i32
    %9 = arith.index_cast %c1_i32 : i32 to index
    %c0_3 = arith.constant 0 : index
    %c0_4 = arith.constant 0 : index
    %10 = vector.load %arg2[%9, %c0_3, %c0_4] : memref<16x16x256xf32, #tpu.memory_space<vmem>>, vector<1x16x256xf32>
    %11 = vector.shape_cast %10 : vector<1x16x256xf32> to vector<16x256xf32>
    %12 = arith.addf %4, %11 : vector<16x256xf32>
    %13 = arith.index_cast %c1_i32 : i32 to index
    %c0_5 = arith.constant 0 : index
    %c0_6 = arith.constant 0 : index
    %14 = vector.load %arg3[%13, %c0_5, %c0_6] : memref<16x16x256xf32, #tpu.memory_space<vmem>>, vector<1x16x256xf32>
    %15 = vector.shape_cast %14 : vector<1x16x256xf32> to vector<16x256xf32>
    %16 = arith.addf %8, %15 : vector<16x256xf32>
    %c2_i32 = arith.constant 2 : i32
    %17 = arith.index_cast %c2_i32 : i32 to index
    %c0_7 = arith.constant 0 : index
    %c0_8 = arith.constant 0 : index
    %18 = vector.load %arg2[%17, %c0_7, %c0_8] : memref<16x16x256xf32, #tpu.memory_space<vmem>>, vector<1x16x256xf32>
    %19 = vector.shape_cast %18 : vector<1x16x256xf32> to vector<16x256xf32>
    %20 = arith.addf %12, %19 : vector<16x256xf32>
    %21 = arith.index_cast %c2_i32 : i32 to index
    %c0_9 = arith.constant 0 : index
    %c0_10 = arith.constant 0 : index
    %22 = vector.load %arg3[%21, %c0_9, %c0_10] : memref<16x16x256xf32, #tpu.memory_space<vmem>>, vector<1x16x256xf32>
    %23 = vector.shape_cast %22 : vector<1x16x256xf32> to vector<16x256xf32>
    %24 = arith.addf %16, %23 : vector<16x256xf32>
    %c3_i32 = arith.constant 3 : i32
    %25 = arith.index_cast %c3_i32 : i32 to index
    %c0_11 = arith.constant 0 : index
    %c0_12 = arith.constant 0 : index
    %26 = vector.load %arg2[%25, %c0_11, %c0_12] : memref<16x16x256xf32, #tpu.memory_space<vmem>>, vector<1x16x256xf32>
    %27 = vector.shape_cast %26 : vector<1x16x256xf32> to vector<16x256xf32>
    %28 = arith.addf %20, %27 : vector<16x256xf32>
    %29 = arith.index_cast %c3_i32 : i32 to index
    %c0_13 = arith.constant 0 : index
    %c0_14 = arith.constant 0 : index
    %30 = vector.load %arg3[%29, %c0_13, %c0_14] : memref<16x16x256xf32, #tpu.memory_space<vmem>>, vector<1x16x256xf32>
    %31 = vector.shape_cast %30 : vector<1x16x256xf32> to vector<16x256xf32>
    %32 = arith.addf %24, %31 : vector<16x256xf32>
    %c4_i32 = arith.constant 4 : i32
    %33 = arith.index_cast %c4_i32 : i32 to index
    %c0_15 = arith.constant 0 : index
    %c0_16 = arith.constant 0 : index
    %34 = vector.load %arg2[%33, %c0_15, %c0_16] : memref<16x16x256xf32, #tpu.memory_space<vmem>>, vector<1x16x256xf32>
    %35 = vector.shape_cast %34 : vector<1x16x256xf32> to vector<16x256xf32>
    %36 = arith.addf %28, %35 : vector<16x256xf32>
    %37 = arith.index_cast %c4_i32 : i32 to index
    %c0_17 = arith.constant 0 : index
    %c0_18 = arith.constant 0 : index
    %38 = vector.load %arg3[%37, %c0_17, %c0_18] : memref<16x16x256xf32, #tpu.memory_space<vmem>>, vector<1x16x256xf32>
    %39 = vector.shape_cast %38 : vector<1x16x256xf32> to vector<16x256xf32>
    %40 = arith.addf %32, %39 : vector<16x256xf32>
    %c5_i32 = arith.constant 5 : i32
    %41 = arith.index_cast %c5_i32 : i32 to index
    %c0_19 = arith.constant 0 : index
    %c0_20 = arith.constant 0 : index
    %42 = vector.load %arg2[%41, %c0_19, %c0_20] : memref<16x16x256xf32, #tpu.memory_space<vmem>>, vector<1x16x256xf32>
    %43 = vector.shape_cast %42 : vector<1x16x256xf32> to vector<16x256xf32>
    %44 = arith.addf %36, %43 : vector<16x256xf32>
    %45 = arith.index_cast %c5_i32 : i32 to index
    %c0_21 = arith.constant 0 : index
    %c0_22 = arith.constant 0 : index
    %46 = vector.load %arg3[%45, %c0_21, %c0_22] : memref<16x16x256xf32, #tpu.memory_space<vmem>>, vector<1x16x256xf32>
    %47 = vector.shape_cast %46 : vector<1x16x256xf32> to vector<16x256xf32>
    %48 = arith.addf %40, %47 : vector<16x256xf32>
    %c6_i32 = arith.constant 6 : i32
    %49 = arith.index_cast %c6_i32 : i32 to index
    %c0_23 = arith.constant 0 : index
    %c0_24 = arith.constant 0 : index
    %50 = vector.load %arg2[%49, %c0_23, %c0_24] : memref<16x16x256xf32, #tpu.memory_space<vmem>>, vector<1x16x256xf32>
    %51 = vector.shape_cast %50 : vector<1x16x256xf32> to vector<16x256xf32>
    %52 = arith.addf %44, %51 : vector<16x256xf32>
    %53 = arith.index_cast %c6_i32 : i32 to index
    %c0_25 = arith.constant 0 : index
    %c0_26 = arith.constant 0 : index
    %54 = vector.load %arg3[%53, %c0_25, %c0_26] : memref<16x16x256xf32, #tpu.memory_space<vmem>>, vector<1x16x256xf32>
    %55 = vector.shape_cast %54 : vector<1x16x256xf32> to vector<16x256xf32>
    %56 = arith.addf %48, %55 : vector<16x256xf32>
    %c7_i32 = arith.constant 7 : i32
    %57 = arith.index_cast %c7_i32 : i32 to index
    %c0_27 = arith.constant 0 : index
    %c0_28 = arith.constant 0 : index
    %58 = vector.load %arg2[%57, %c0_27, %c0_28] : memref<16x16x256xf32, #tpu.memory_space<vmem>>, vector<1x16x256xf32>
    %59 = vector.shape_cast %58 : vector<1x16x256xf32> to vector<16x256xf32>
    %60 = arith.addf %52, %59 : vector<16x256xf32>
    %61 = arith.index_cast %c7_i32 : i32 to index
    %c0_29 = arith.constant 0 : index
    %c0_30 = arith.constant 0 : index
    %62 = vector.load %arg3[%61, %c0_29, %c0_30] : memref<16x16x256xf32, #tpu.memory_space<vmem>>, vector<1x16x256xf32>
    %63 = vector.shape_cast %62 : vector<1x16x256xf32> to vector<16x256xf32>
    %64 = arith.addf %56, %63 : vector<16x256xf32>
    %c8_i32 = arith.constant 8 : i32
    %65 = arith.index_cast %c8_i32 : i32 to index
    %c0_31 = arith.constant 0 : index
    %c0_32 = arith.constant 0 : index
    %66 = vector.load %arg2[%65, %c0_31, %c0_32] : memref<16x16x256xf32, #tpu.memory_space<vmem>>, vector<1x16x256xf32>
    %67 = vector.shape_cast %66 : vector<1x16x256xf32> to vector<16x256xf32>
    %68 = arith.addf %60, %67 : vector<16x256xf32>
    %69 = arith.index_cast %c8_i32 : i32 to index
    %c0_33 = arith.constant 0 : index
    %c0_34 = arith.constant 0 : index
    %70 = vector.load %arg3[%69, %c0_33, %c0_34] : memref<16x16x256xf32, #tpu.memory_space<vmem>>, vector<1x16x256xf32>
    %71 = vector.shape_cast %70 : vector<1x16x256xf32> to vector<16x256xf32>
    %72 = arith.addf %64, %71 : vector<16x256xf32>
    %c9_i32 = arith.constant 9 : i32
    %73 = arith.index_cast %c9_i32 : i32 to index
    %c0_35 = arith.constant 0 : index
    %c0_36 = arith.constant 0 : index
    %74 = vector.load %arg2[%73, %c0_35, %c0_36] : memref<16x16x256xf32, #tpu.memory_space<vmem>>, vector<1x16x256xf32>
    %75 = vector.shape_cast %74 : vector<1x16x256xf32> to vector<16x256xf32>
    %76 = arith.addf %68, %75 : vector<16x256xf32>
    %77 = arith.index_cast %c9_i32 : i32 to index
    %c0_37 = arith.constant 0 : index
    %c0_38 = arith.constant 0 : index
    %78 = vector.load %arg3[%77, %c0_37, %c0_38] : memref<16x16x256xf32, #tpu.memory_space<vmem>>, vector<1x16x256xf32>
    %79 = vector.shape_cast %78 : vector<1x16x256xf32> to vector<16x256xf32>
    %80 = arith.addf %72, %79 : vector<16x256xf32>
    %c10_i32 = arith.constant 10 : i32
    %81 = arith.index_cast %c10_i32 : i32 to index
    %c0_39 = arith.constant 0 : index
    %c0_40 = arith.constant 0 : index
    %82 = vector.load %arg2[%81, %c0_39, %c0_40] : memref<16x16x256xf32, #tpu.memory_space<vmem>>, vector<1x16x256xf32>
    %83 = vector.shape_cast %82 : vector<1x16x256xf32> to vector<16x256xf32>
    %84 = arith.addf %76, %83 : vector<16x256xf32>
    %85 = arith.index_cast %c10_i32 : i32 to index
    %c0_41 = arith.constant 0 : index
    %c0_42 = arith.constant 0 : index
    %86 = vector.load %arg3[%85, %c0_41, %c0_42] : memref<16x16x256xf32, #tpu.memory_space<vmem>>, vector<1x16x256xf32>
    %87 = vector.shape_cast %86 : vector<1x16x256xf32> to vector<16x256xf32>
    %88 = arith.addf %80, %87 : vector<16x256xf32>
    %c11_i32 = arith.constant 11 : i32
    %89 = arith.index_cast %c11_i32 : i32 to index
    %c0_43 = arith.constant 0 : index
    %c0_44 = arith.constant 0 : index
    %90 = vector.load %arg2[%89, %c0_43, %c0_44] : memref<16x16x256xf32, #tpu.memory_space<vmem>>, vector<1x16x256xf32>
    %91 = vector.shape_cast %90 : vector<1x16x256xf32> to vector<16x256xf32>
    %92 = arith.addf %84, %91 : vector<16x256xf32>
    %93 = arith.index_cast %c11_i32 : i32 to index
    %c0_45 = arith.constant 0 : index
    %c0_46 = arith.constant 0 : index
    %94 = vector.load %arg3[%93, %c0_45, %c0_46] : memref<16x16x256xf32, #tpu.memory_space<vmem>>, vector<1x16x256xf32>
    %95 = vector.shape_cast %94 : vector<1x16x256xf32> to vector<16x256xf32>
    %96 = arith.addf %88, %95 : vector<16x256xf32>
    %c12_i32 = arith.constant 12 : i32
    %97 = arith.index_cast %c12_i32 : i32 to index
    %c0_47 = arith.constant 0 : index
    %c0_48 = arith.constant 0 : index
    %98 = vector.load %arg2[%97, %c0_47, %c0_48] : memref<16x16x256xf32, #tpu.memory_space<vmem>>, vector<1x16x256xf32>
    %99 = vector.shape_cast %98 : vector<1x16x256xf32> to vector<16x256xf32>
    %100 = arith.addf %92, %99 : vector<16x256xf32>
    %101 = arith.index_cast %c12_i32 : i32 to index
    %c0_49 = arith.constant 0 : index
    %c0_50 = arith.constant 0 : index
    %102 = vector.load %arg3[%101, %c0_49, %c0_50] : memref<16x16x256xf32, #tpu.memory_space<vmem>>, vector<1x16x256xf32>
    %103 = vector.shape_cast %102 : vector<1x16x256xf32> to vector<16x256xf32>
    %104 = arith.addf %96, %103 : vector<16x256xf32>
    %c13_i32 = arith.constant 13 : i32
    %105 = arith.index_cast %c13_i32 : i32 to index
    %c0_51 = arith.constant 0 : index
    %c0_52 = arith.constant 0 : index
    %106 = vector.load %arg2[%105, %c0_51, %c0_52] : memref<16x16x256xf32, #tpu.memory_space<vmem>>, vector<1x16x256xf32>
    %107 = vector.shape_cast %106 : vector<1x16x256xf32> to vector<16x256xf32>
    %108 = arith.addf %100, %107 : vector<16x256xf32>
    %109 = arith.index_cast %c13_i32 : i32 to index
    %c0_53 = arith.constant 0 : index
    %c0_54 = arith.constant 0 : index
    %110 = vector.load %arg3[%109, %c0_53, %c0_54] : memref<16x16x256xf32, #tpu.memory_space<vmem>>, vector<1x16x256xf32>
    %111 = vector.shape_cast %110 : vector<1x16x256xf32> to vector<16x256xf32>
    %112 = arith.addf %104, %111 : vector<16x256xf32>
    %c14_i32 = arith.constant 14 : i32
    %113 = arith.index_cast %c14_i32 : i32 to index
    %c0_55 = arith.constant 0 : index
    %c0_56 = arith.constant 0 : index
    %114 = vector.load %arg2[%113, %c0_55, %c0_56] : memref<16x16x256xf32, #tpu.memory_space<vmem>>, vector<1x16x256xf32>
    %115 = vector.shape_cast %114 : vector<1x16x256xf32> to vector<16x256xf32>
    %116 = arith.addf %108, %115 : vector<16x256xf32>
    %117 = arith.index_cast %c14_i32 : i32 to index
    %c0_57 = arith.constant 0 : index
    %c0_58 = arith.constant 0 : index
    %118 = vector.load %arg3[%117, %c0_57, %c0_58] : memref<16x16x256xf32, #tpu.memory_space<vmem>>, vector<1x16x256xf32>
    %119 = vector.shape_cast %118 : vector<1x16x256xf32> to vector<16x256xf32>
    %120 = arith.addf %112, %119 : vector<16x256xf32>
    %c15_i32 = arith.constant 15 : i32
    %121 = arith.index_cast %c15_i32 : i32 to index
    %c0_59 = arith.constant 0 : index
    %c0_60 = arith.constant 0 : index
    %122 = vector.load %arg2[%121, %c0_59, %c0_60] : memref<16x16x256xf32, #tpu.memory_space<vmem>>, vector<1x16x256xf32>
    %123 = vector.shape_cast %122 : vector<1x16x256xf32> to vector<16x256xf32>
    %124 = arith.addf %116, %123 : vector<16x256xf32>
    %125 = arith.index_cast %c15_i32 : i32 to index
    %c0_61 = arith.constant 0 : index
    %c0_62 = arith.constant 0 : index
    %126 = vector.load %arg3[%125, %c0_61, %c0_62] : memref<16x16x256xf32, #tpu.memory_space<vmem>>, vector<1x16x256xf32>
    %127 = vector.shape_cast %126 : vector<1x16x256xf32> to vector<16x256xf32>
    %128 = arith.addf %120, %127 : vector<16x256xf32>
    %c16_i32 = arith.constant 16 : i32
    %cst_63 = arith.constant 6.250000e-02 : f32
    %129 = vector.broadcast %cst_63 : f32 to vector<16x256xf32>
    %130 = arith.mulf %124, %129 : vector<16x256xf32>
    %cst_64 = arith.constant 6.250000e-02 : f32
    %131 = vector.broadcast %cst_64 : f32 to vector<16x256xf32>
    %132 = arith.mulf %128, %131 : vector<16x256xf32>
    %c0_i32_65 = arith.constant 0 : i32
    %133 = arith.index_cast %c0_i32_65 : i32 to index
    %c0_66 = arith.constant 0 : index
    %c0_67 = arith.constant 0 : index
    %134 = vector.load %arg2[%133, %c0_66, %c0_67] : memref<16x16x256xf32, #tpu.memory_space<vmem>>, vector<1x16x256xf32>
    %135 = vector.shape_cast %134 : vector<1x16x256xf32> to vector<16x256xf32>
    %136 = arith.subf %135, %130 : vector<16x256xf32>
    %137 = arith.index_cast %c0_i32_65 : i32 to index
    %c0_68 = arith.constant 0 : index
    %c0_69 = arith.constant 0 : index
    %138 = vector.load %arg3[%137, %c0_68, %c0_69] : memref<16x16x256xf32, #tpu.memory_space<vmem>>, vector<1x16x256xf32>
    %139 = vector.shape_cast %138 : vector<1x16x256xf32> to vector<16x256xf32>
    %140 = arith.subf %139, %132 : vector<16x256xf32>
    %141 = arith.mulf %136, %140 : vector<16x256xf32>
    %142 = arith.addf %0, %141 : vector<16x256xf32>
    %143 = arith.mulf %136, %136 : vector<16x256xf32>
    %144 = arith.addf %0, %143 : vector<16x256xf32>
    %145 = arith.mulf %140, %140 : vector<16x256xf32>
    %146 = arith.addf %0, %145 : vector<16x256xf32>
    %c1_i32_70 = arith.constant 1 : i32
    %147 = arith.index_cast %c1_i32_70 : i32 to index
    %c0_71 = arith.constant 0 : index
    %c0_72 = arith.constant 0 : index
    %148 = vector.load %arg2[%147, %c0_71, %c0_72] : memref<16x16x256xf32, #tpu.memory_space<vmem>>, vector<1x16x256xf32>
    %149 = vector.shape_cast %148 : vector<1x16x256xf32> to vector<16x256xf32>
    %150 = arith.subf %149, %130 : vector<16x256xf32>
    %151 = arith.index_cast %c1_i32_70 : i32 to index
    %c0_73 = arith.constant 0 : index
    %c0_74 = arith.constant 0 : index
    %152 = vector.load %arg3[%151, %c0_73, %c0_74] : memref<16x16x256xf32, #tpu.memory_space<vmem>>, vector<1x16x256xf32>
    %153 = vector.shape_cast %152 : vector<1x16x256xf32> to vector<16x256xf32>
    %154 = arith.subf %153, %132 : vector<16x256xf32>
    %155 = arith.mulf %150, %154 : vector<16x256xf32>
    %156 = arith.addf %142, %155 : vector<16x256xf32>
    %157 = arith.mulf %150, %150 : vector<16x256xf32>
    %158 = arith.addf %144, %157 : vector<16x256xf32>
    %159 = arith.mulf %154, %154 : vector<16x256xf32>
    %160 = arith.addf %146, %159 : vector<16x256xf32>
    %c2_i32_75 = arith.constant 2 : i32
    %161 = arith.index_cast %c2_i32_75 : i32 to index
    %c0_76 = arith.constant 0 : index
    %c0_77 = arith.constant 0 : index
    %162 = vector.load %arg2[%161, %c0_76, %c0_77] : memref<16x16x256xf32, #tpu.memory_space<vmem>>, vector<1x16x256xf32>
    %163 = vector.shape_cast %162 : vector<1x16x256xf32> to vector<16x256xf32>
    %164 = arith.subf %163, %130 : vector<16x256xf32>
    %165 = arith.index_cast %c2_i32_75 : i32 to index
    %c0_78 = arith.constant 0 : index
    %c0_79 = arith.constant 0 : index
    %166 = vector.load %arg3[%165, %c0_78, %c0_79] : memref<16x16x256xf32, #tpu.memory_space<vmem>>, vector<1x16x256xf32>
    %167 = vector.shape_cast %166 : vector<1x16x256xf32> to vector<16x256xf32>
    %168 = arith.subf %167, %132 : vector<16x256xf32>
    %169 = arith.mulf %164, %168 : vector<16x256xf32>
    %170 = arith.addf %156, %169 : vector<16x256xf32>
    %171 = arith.mulf %164, %164 : vector<16x256xf32>
    %172 = arith.addf %158, %171 : vector<16x256xf32>
    %173 = arith.mulf %168, %168 : vector<16x256xf32>
    %174 = arith.addf %160, %173 : vector<16x256xf32>
    %c3_i32_80 = arith.constant 3 : i32
    %175 = arith.index_cast %c3_i32_80 : i32 to index
    %c0_81 = arith.constant 0 : index
    %c0_82 = arith.constant 0 : index
    %176 = vector.load %arg2[%175, %c0_81, %c0_82] : memref<16x16x256xf32, #tpu.memory_space<vmem>>, vector<1x16x256xf32>
    %177 = vector.shape_cast %176 : vector<1x16x256xf32> to vector<16x256xf32>
    %178 = arith.subf %177, %130 : vector<16x256xf32>
    %179 = arith.index_cast %c3_i32_80 : i32 to index
    %c0_83 = arith.constant 0 : index
    %c0_84 = arith.constant 0 : index
    %180 = vector.load %arg3[%179, %c0_83, %c0_84] : memref<16x16x256xf32, #tpu.memory_space<vmem>>, vector<1x16x256xf32>
    %181 = vector.shape_cast %180 : vector<1x16x256xf32> to vector<16x256xf32>
    %182 = arith.subf %181, %132 : vector<16x256xf32>
    %183 = arith.mulf %178, %182 : vector<16x256xf32>
    %184 = arith.addf %170, %183 : vector<16x256xf32>
    %185 = arith.mulf %178, %178 : vector<16x256xf32>
    %186 = arith.addf %172, %185 : vector<16x256xf32>
    %187 = arith.mulf %182, %182 : vector<16x256xf32>
    %188 = arith.addf %174, %187 : vector<16x256xf32>
    %c4_i32_85 = arith.constant 4 : i32
    %189 = arith.index_cast %c4_i32_85 : i32 to index
    %c0_86 = arith.constant 0 : index
    %c0_87 = arith.constant 0 : index
    %190 = vector.load %arg2[%189, %c0_86, %c0_87] : memref<16x16x256xf32, #tpu.memory_space<vmem>>, vector<1x16x256xf32>
    %191 = vector.shape_cast %190 : vector<1x16x256xf32> to vector<16x256xf32>
    %192 = arith.subf %191, %130 : vector<16x256xf32>
    %193 = arith.index_cast %c4_i32_85 : i32 to index
    %c0_88 = arith.constant 0 : index
    %c0_89 = arith.constant 0 : index
    %194 = vector.load %arg3[%193, %c0_88, %c0_89] : memref<16x16x256xf32, #tpu.memory_space<vmem>>, vector<1x16x256xf32>
    %195 = vector.shape_cast %194 : vector<1x16x256xf32> to vector<16x256xf32>
    %196 = arith.subf %195, %132 : vector<16x256xf32>
    %197 = arith.mulf %192, %196 : vector<16x256xf32>
    %198 = arith.addf %184, %197 : vector<16x256xf32>
    %199 = arith.mulf %192, %192 : vector<16x256xf32>
    %200 = arith.addf %186, %199 : vector<16x256xf32>
    %201 = arith.mulf %196, %196 : vector<16x256xf32>
    %202 = arith.addf %188, %201 : vector<16x256xf32>
    %c5_i32_90 = arith.constant 5 : i32
    %203 = arith.index_cast %c5_i32_90 : i32 to index
    %c0_91 = arith.constant 0 : index
    %c0_92 = arith.constant 0 : index
    %204 = vector.load %arg2[%203, %c0_91, %c0_92] : memref<16x16x256xf32, #tpu.memory_space<vmem>>, vector<1x16x256xf32>
    %205 = vector.shape_cast %204 : vector<1x16x256xf32> to vector<16x256xf32>
    %206 = arith.subf %205, %130 : vector<16x256xf32>
    %207 = arith.index_cast %c5_i32_90 : i32 to index
    %c0_93 = arith.constant 0 : index
    %c0_94 = arith.constant 0 : index
    %208 = vector.load %arg3[%207, %c0_93, %c0_94] : memref<16x16x256xf32, #tpu.memory_space<vmem>>, vector<1x16x256xf32>
    %209 = vector.shape_cast %208 : vector<1x16x256xf32> to vector<16x256xf32>
    %210 = arith.subf %209, %132 : vector<16x256xf32>
    %211 = arith.mulf %206, %210 : vector<16x256xf32>
    %212 = arith.addf %198, %211 : vector<16x256xf32>
    %213 = arith.mulf %206, %206 : vector<16x256xf32>
    %214 = arith.addf %200, %213 : vector<16x256xf32>
    %215 = arith.mulf %210, %210 : vector<16x256xf32>
    %216 = arith.addf %202, %215 : vector<16x256xf32>
    %c6_i32_95 = arith.constant 6 : i32
    %217 = arith.index_cast %c6_i32_95 : i32 to index
    %c0_96 = arith.constant 0 : index
    %c0_97 = arith.constant 0 : index
    %218 = vector.load %arg2[%217, %c0_96, %c0_97] : memref<16x16x256xf32, #tpu.memory_space<vmem>>, vector<1x16x256xf32>
    %219 = vector.shape_cast %218 : vector<1x16x256xf32> to vector<16x256xf32>
    %220 = arith.subf %219, %130 : vector<16x256xf32>
    %221 = arith.index_cast %c6_i32_95 : i32 to index
    %c0_98 = arith.constant 0 : index
    %c0_99 = arith.constant 0 : index
    %222 = vector.load %arg3[%221, %c0_98, %c0_99] : memref<16x16x256xf32, #tpu.memory_space<vmem>>, vector<1x16x256xf32>
    %223 = vector.shape_cast %222 : vector<1x16x256xf32> to vector<16x256xf32>
    %224 = arith.subf %223, %132 : vector<16x256xf32>
    %225 = arith.mulf %220, %224 : vector<16x256xf32>
    %226 = arith.addf %212, %225 : vector<16x256xf32>
    %227 = arith.mulf %220, %220 : vector<16x256xf32>
    %228 = arith.addf %214, %227 : vector<16x256xf32>
    %229 = arith.mulf %224, %224 : vector<16x256xf32>
    %230 = arith.addf %216, %229 : vector<16x256xf32>
    %c7_i32_100 = arith.constant 7 : i32
    %231 = arith.index_cast %c7_i32_100 : i32 to index
    %c0_101 = arith.constant 0 : index
    %c0_102 = arith.constant 0 : index
    %232 = vector.load %arg2[%231, %c0_101, %c0_102] : memref<16x16x256xf32, #tpu.memory_space<vmem>>, vector<1x16x256xf32>
    %233 = vector.shape_cast %232 : vector<1x16x256xf32> to vector<16x256xf32>
    %234 = arith.subf %233, %130 : vector<16x256xf32>
    %235 = arith.index_cast %c7_i32_100 : i32 to index
    %c0_103 = arith.constant 0 : index
    %c0_104 = arith.constant 0 : index
    %236 = vector.load %arg3[%235, %c0_103, %c0_104] : memref<16x16x256xf32, #tpu.memory_space<vmem>>, vector<1x16x256xf32>
    %237 = vector.shape_cast %236 : vector<1x16x256xf32> to vector<16x256xf32>
    %238 = arith.subf %237, %132 : vector<16x256xf32>
    %239 = arith.mulf %234, %238 : vector<16x256xf32>
    %240 = arith.addf %226, %239 : vector<16x256xf32>
    %241 = arith.mulf %234, %234 : vector<16x256xf32>
    %242 = arith.addf %228, %241 : vector<16x256xf32>
    %243 = arith.mulf %238, %238 : vector<16x256xf32>
    %244 = arith.addf %230, %243 : vector<16x256xf32>
    %c8_i32_105 = arith.constant 8 : i32
    %245 = arith.index_cast %c8_i32_105 : i32 to index
    %c0_106 = arith.constant 0 : index
    %c0_107 = arith.constant 0 : index
    %246 = vector.load %arg2[%245, %c0_106, %c0_107] : memref<16x16x256xf32, #tpu.memory_space<vmem>>, vector<1x16x256xf32>
    %247 = vector.shape_cast %246 : vector<1x16x256xf32> to vector<16x256xf32>
    %248 = arith.subf %247, %130 : vector<16x256xf32>
    %249 = arith.index_cast %c8_i32_105 : i32 to index
    %c0_108 = arith.constant 0 : index
    %c0_109 = arith.constant 0 : index
    %250 = vector.load %arg3[%249, %c0_108, %c0_109] : memref<16x16x256xf32, #tpu.memory_space<vmem>>, vector<1x16x256xf32>
    %251 = vector.shape_cast %250 : vector<1x16x256xf32> to vector<16x256xf32>
    %252 = arith.subf %251, %132 : vector<16x256xf32>
    %253 = arith.mulf %248, %252 : vector<16x256xf32>
    %254 = arith.addf %240, %253 : vector<16x256xf32>
    %255 = arith.mulf %248, %248 : vector<16x256xf32>
    %256 = arith.addf %242, %255 : vector<16x256xf32>
    %257 = arith.mulf %252, %252 : vector<16x256xf32>
    %258 = arith.addf %244, %257 : vector<16x256xf32>
    %c9_i32_110 = arith.constant 9 : i32
    %259 = arith.index_cast %c9_i32_110 : i32 to index
    %c0_111 = arith.constant 0 : index
    %c0_112 = arith.constant 0 : index
    %260 = vector.load %arg2[%259, %c0_111, %c0_112] : memref<16x16x256xf32, #tpu.memory_space<vmem>>, vector<1x16x256xf32>
    %261 = vector.shape_cast %260 : vector<1x16x256xf32> to vector<16x256xf32>
    %262 = arith.subf %261, %130 : vector<16x256xf32>
    %263 = arith.index_cast %c9_i32_110 : i32 to index
    %c0_113 = arith.constant 0 : index
    %c0_114 = arith.constant 0 : index
    %264 = vector.load %arg3[%263, %c0_113, %c0_114] : memref<16x16x256xf32, #tpu.memory_space<vmem>>, vector<1x16x256xf32>
    %265 = vector.shape_cast %264 : vector<1x16x256xf32> to vector<16x256xf32>
    %266 = arith.subf %265, %132 : vector<16x256xf32>
    %267 = arith.mulf %262, %266 : vector<16x256xf32>
    %268 = arith.addf %254, %267 : vector<16x256xf32>
    %269 = arith.mulf %262, %262 : vector<16x256xf32>
    %270 = arith.addf %256, %269 : vector<16x256xf32>
    %271 = arith.mulf %266, %266 : vector<16x256xf32>
    %272 = arith.addf %258, %271 : vector<16x256xf32>
    %c10_i32_115 = arith.constant 10 : i32
    %273 = arith.index_cast %c10_i32_115 : i32 to index
    %c0_116 = arith.constant 0 : index
    %c0_117 = arith.constant 0 : index
    %274 = vector.load %arg2[%273, %c0_116, %c0_117] : memref<16x16x256xf32, #tpu.memory_space<vmem>>, vector<1x16x256xf32>
    %275 = vector.shape_cast %274 : vector<1x16x256xf32> to vector<16x256xf32>
    %276 = arith.subf %275, %130 : vector<16x256xf32>
    %277 = arith.index_cast %c10_i32_115 : i32 to index
    %c0_118 = arith.constant 0 : index
    %c0_119 = arith.constant 0 : index
    %278 = vector.load %arg3[%277, %c0_118, %c0_119] : memref<16x16x256xf32, #tpu.memory_space<vmem>>, vector<1x16x256xf32>
    %279 = vector.shape_cast %278 : vector<1x16x256xf32> to vector<16x256xf32>
    %280 = arith.subf %279, %132 : vector<16x256xf32>
    %281 = arith.mulf %276, %280 : vector<16x256xf32>
    %282 = arith.addf %268, %281 : vector<16x256xf32>
    %283 = arith.mulf %276, %276 : vector<16x256xf32>
    %284 = arith.addf %270, %283 : vector<16x256xf32>
    %285 = arith.mulf %280, %280 : vector<16x256xf32>
    %286 = arith.addf %272, %285 : vector<16x256xf32>
    %c11_i32_120 = arith.constant 11 : i32
    %287 = arith.index_cast %c11_i32_120 : i32 to index
    %c0_121 = arith.constant 0 : index
    %c0_122 = arith.constant 0 : index
    %288 = vector.load %arg2[%287, %c0_121, %c0_122] : memref<16x16x256xf32, #tpu.memory_space<vmem>>, vector<1x16x256xf32>
    %289 = vector.shape_cast %288 : vector<1x16x256xf32> to vector<16x256xf32>
    %290 = arith.subf %289, %130 : vector<16x256xf32>
    %291 = arith.index_cast %c11_i32_120 : i32 to index
    %c0_123 = arith.constant 0 : index
    %c0_124 = arith.constant 0 : index
    %292 = vector.load %arg3[%291, %c0_123, %c0_124] : memref<16x16x256xf32, #tpu.memory_space<vmem>>, vector<1x16x256xf32>
    %293 = vector.shape_cast %292 : vector<1x16x256xf32> to vector<16x256xf32>
    %294 = arith.subf %293, %132 : vector<16x256xf32>
    %295 = arith.mulf %290, %294 : vector<16x256xf32>
    %296 = arith.addf %282, %295 : vector<16x256xf32>
    %297 = arith.mulf %290, %290 : vector<16x256xf32>
    %298 = arith.addf %284, %297 : vector<16x256xf32>
    %299 = arith.mulf %294, %294 : vector<16x256xf32>
    %300 = arith.addf %286, %299 : vector<16x256xf32>
    %c12_i32_125 = arith.constant 12 : i32
    %301 = arith.index_cast %c12_i32_125 : i32 to index
    %c0_126 = arith.constant 0 : index
    %c0_127 = arith.constant 0 : index
    %302 = vector.load %arg2[%301, %c0_126, %c0_127] : memref<16x16x256xf32, #tpu.memory_space<vmem>>, vector<1x16x256xf32>
    %303 = vector.shape_cast %302 : vector<1x16x256xf32> to vector<16x256xf32>
    %304 = arith.subf %303, %130 : vector<16x256xf32>
    %305 = arith.index_cast %c12_i32_125 : i32 to index
    %c0_128 = arith.constant 0 : index
    %c0_129 = arith.constant 0 : index
    %306 = vector.load %arg3[%305, %c0_128, %c0_129] : memref<16x16x256xf32, #tpu.memory_space<vmem>>, vector<1x16x256xf32>
    %307 = vector.shape_cast %306 : vector<1x16x256xf32> to vector<16x256xf32>
    %308 = arith.subf %307, %132 : vector<16x256xf32>
    %309 = arith.mulf %304, %308 : vector<16x256xf32>
    %310 = arith.addf %296, %309 : vector<16x256xf32>
    %311 = arith.mulf %304, %304 : vector<16x256xf32>
    %312 = arith.addf %298, %311 : vector<16x256xf32>
    %313 = arith.mulf %308, %308 : vector<16x256xf32>
    %314 = arith.addf %300, %313 : vector<16x256xf32>
    %c13_i32_130 = arith.constant 13 : i32
    %315 = arith.index_cast %c13_i32_130 : i32 to index
    %c0_131 = arith.constant 0 : index
    %c0_132 = arith.constant 0 : index
    %316 = vector.load %arg2[%315, %c0_131, %c0_132] : memref<16x16x256xf32, #tpu.memory_space<vmem>>, vector<1x16x256xf32>
    %317 = vector.shape_cast %316 : vector<1x16x256xf32> to vector<16x256xf32>
    %318 = arith.subf %317, %130 : vector<16x256xf32>
    %319 = arith.index_cast %c13_i32_130 : i32 to index
    %c0_133 = arith.constant 0 : index
    %c0_134 = arith.constant 0 : index
    %320 = vector.load %arg3[%319, %c0_133, %c0_134] : memref<16x16x256xf32, #tpu.memory_space<vmem>>, vector<1x16x256xf32>
    %321 = vector.shape_cast %320 : vector<1x16x256xf32> to vector<16x256xf32>
    %322 = arith.subf %321, %132 : vector<16x256xf32>
    %323 = arith.mulf %318, %322 : vector<16x256xf32>
    %324 = arith.addf %310, %323 : vector<16x256xf32>
    %325 = arith.mulf %318, %318 : vector<16x256xf32>
    %326 = arith.addf %312, %325 : vector<16x256xf32>
    %327 = arith.mulf %322, %322 : vector<16x256xf32>
    %328 = arith.addf %314, %327 : vector<16x256xf32>
    %c14_i32_135 = arith.constant 14 : i32
    %329 = arith.index_cast %c14_i32_135 : i32 to index
    %c0_136 = arith.constant 0 : index
    %c0_137 = arith.constant 0 : index
    %330 = vector.load %arg2[%329, %c0_136, %c0_137] : memref<16x16x256xf32, #tpu.memory_space<vmem>>, vector<1x16x256xf32>
    %331 = vector.shape_cast %330 : vector<1x16x256xf32> to vector<16x256xf32>
    %332 = arith.subf %331, %130 : vector<16x256xf32>
    %333 = arith.index_cast %c14_i32_135 : i32 to index
    %c0_138 = arith.constant 0 : index
    %c0_139 = arith.constant 0 : index
    %334 = vector.load %arg3[%333, %c0_138, %c0_139] : memref<16x16x256xf32, #tpu.memory_space<vmem>>, vector<1x16x256xf32>
    %335 = vector.shape_cast %334 : vector<1x16x256xf32> to vector<16x256xf32>
    %336 = arith.subf %335, %132 : vector<16x256xf32>
    %337 = arith.mulf %332, %336 : vector<16x256xf32>
    %338 = arith.addf %324, %337 : vector<16x256xf32>
    %339 = arith.mulf %332, %332 : vector<16x256xf32>
    %340 = arith.addf %326, %339 : vector<16x256xf32>
    %341 = arith.mulf %336, %336 : vector<16x256xf32>
    %342 = arith.addf %328, %341 : vector<16x256xf32>
    %c15_i32_140 = arith.constant 15 : i32
    %343 = arith.index_cast %c15_i32_140 : i32 to index
    %c0_141 = arith.constant 0 : index
    %c0_142 = arith.constant 0 : index
    %344 = vector.load %arg2[%343, %c0_141, %c0_142] : memref<16x16x256xf32, #tpu.memory_space<vmem>>, vector<1x16x256xf32>
    %345 = vector.shape_cast %344 : vector<1x16x256xf32> to vector<16x256xf32>
    %346 = arith.subf %345, %130 : vector<16x256xf32>
    %347 = arith.index_cast %c15_i32_140 : i32 to index
    %c0_143 = arith.constant 0 : index
    %c0_144 = arith.constant 0 : index
    %348 = vector.load %arg3[%347, %c0_143, %c0_144] : memref<16x16x256xf32, #tpu.memory_space<vmem>>, vector<1x16x256xf32>
    %349 = vector.shape_cast %348 : vector<1x16x256xf32> to vector<16x256xf32>
    %350 = arith.subf %349, %132 : vector<16x256xf32>
    %351 = arith.mulf %346, %350 : vector<16x256xf32>
    %352 = arith.addf %338, %351 : vector<16x256xf32>
    %353 = arith.mulf %346, %346 : vector<16x256xf32>
    %354 = arith.addf %340, %353 : vector<16x256xf32>
    %355 = arith.mulf %350, %350 : vector<16x256xf32>
    %356 = arith.addf %342, %355 : vector<16x256xf32>
    %c16_i32_145 = arith.constant 16 : i32
    %357 = arith.mulf %354, %356 : vector<16x256xf32>
    %358 = math.rsqrt %357 : vector<16x256xf32>
    %359 = arith.mulf %352, %358 : vector<16x256xf32>
    %c0_146 = arith.constant 0 : index
    %c0_147 = arith.constant 0 : index
    %360 = vector.load %arg4[%c0_146, %c0_147] : memref<16x256xf32, #tpu.memory_space<vmem>>, vector<16x256xf32>
    tpu.vector_store %arg4[%c0_146, %c0_147], %359 {strides = array<i32>} : memref<16x256xf32, #tpu.memory_space<vmem>>, vector<16x256xf32>,
    return
  }
  func.func @transform_0(%arg0: i32, %arg1: i32) -> (i32, i32, i32) {
    %c0_i32 = arith.constant 0 : i32
    %c0_i32_0 = arith.constant 0 : i32
    return %c0_i32, %arg0, %arg1 : i32, i32, i32
  }
  func.func @transform_1(%arg0: i32, %arg1: i32) -> (i32, i32, i32) {
    %c0_i32 = arith.constant 0 : i32
    %c0_i32_0 = arith.constant 0 : i32
    return %c0_i32, %arg0, %arg1 : i32, i32, i32
  }
  func.func @transform_2(%arg0: i32, %arg1: i32) -> (i32, i32) {
    %c0_i32 = arith.constant 0 : i32
    return %arg0, %arg1 : i32, i32
  }
}

</mosaic_0001>

<bundles_post_ra>
// kernel: tpu_custom_call.1
= control target key start
LH: loop header
LB: loop body
LE: loop exit
PB: predicated region body
PF: predicated region fallthrough
CT: control target
= control target key end

     0   :  { %7 = vsyncpa [#allocation3], 0  ;;  %s1887_s0 = inlined_call_operand.hbm [shape: f32[16,16,256], index: 0, kind: input, shape index: {}]   ;;  %s1888_s1 = inlined_call_operand.hbm [shape: f32[16,16,256], index: 1, kind: input, shape index: {}]   ;;  %s1889_s2 = inlined_call_operand.hbm [shape: f32[16,256], index: 2, kind: output, shape index: {}]  }
   0x1   :  { %8 = vsyncpa [#allocation6], 0 }
   0x2   :  { %9 = vsyncpa [#allocation4], 0  ;;  %s14_s11 = sshll.u32 %s1887_s0, 4  ;;  %s1013_s12 = smov [#allocation2]   ;;  %s15_s11 = int_to_ptr.hbm [resolvable:$true] %s14_s11 }
   0x3   :  { %s16_s13 = sshll.u32 %s1013_s12, 4  ;;  %s27_s16 = sshll.u32 %s1888_s1, 4  ;;  %s17_s13 = int_to_ptr.vmem [resolvable:$true] %s16_s13  ;;  %s28_s16 = int_to_ptr.hbm [resolvable:$true] %s27_s16 }
   0x4   :  { %s1014_s17 = smov 256   ;;  %s1015_s18 = smov 16  }
   0x5   :  { %22 = dma.hbm_to_vmem [thread:$0]  %s15_s11, 8192, %s17_s13, [#allocation3], %s1014_s17, %s1014_s17, %s1015_s18  }
   0x6   :  { %s1016_s19 = smov [#allocation5]  }
   0x7   :  { %s29_s20 = sshll.u32 %s1016_s19, 4  ;;  %s30_s20 = int_to_ptr.vmem [resolvable:$true] %s29_s20 }
   0x8   :  { %35 = dma.hbm_to_vmem [thread:$0]  %s28_s16, 8192, %s30_s20, [#allocation6], %s1014_s17, %s1014_s17, %s1015_s18  }
   0x9   :  { %1007 = dma.done.wait [#allocation3], 8192  }
   0xa   :  { %1008 = vsyncadd [#allocation3], 4294959104 }
   0xb   :  { %1009 = dma.done.wait [#allocation6], 8192  }
   0xc   :  { %1010 = vsyncadd [#allocation6], 4294959104  ;;  %v1045_v0 = vld [vmem:[#allocation2] sm:$0xff]  ;;  %v1047_v1 = vld [vmem:[#allocation2 + $0x8] sm:$0xff]  ;;  %s1017_s0 = smov [#allocation7]   ;;  %s908_s23 = sshll.u32 %s1889_s2, 4  ;;  %s909_s23 = int_to_ptr.hbm [resolvable:$true] %s908_s23 }
   0xd   :  { %v1049_v2 = vld [vmem:[#allocation2 + $0x10] sm:$0xff]  ;;  %v1051_v3 = vld [vmem:[#allocation2 + $0x18] sm:$0xff]  ;;  %v1053_v4 = vld [vmem:[#allocation5] sm:$0xff]  ;;  %s906_s1 = sshll.u32 %s1017_s0, 4  ;;  %s907_s1 = int_to_ptr.vmem [resolvable:$true] %s906_s1 }
   0xe   :  { %v1055_v5 = vld [vmem:[#allocation5 + $0x8] sm:$0xff]  ;;  %v1057_v6 = vld [vmem:[#allocation5 + $0x10] sm:$0xff]  ;;  %v1059_v7 = vld [vmem:[#allocation5 + $0x18] sm:$0xff] }
   0xf   :  { %v1061_v8 = vld [vmem:[#allocation2 + $0x20] sm:$0xff]  ;;  %v1063_v9 = vld [vmem:[#allocation2 + $0x28] sm:$0xff]  ;;  %v1065_v10 = vld [vmem:[#allocation2 + $0x30] sm:$0xff] }
  0x10   :  { %v1067_v11 = vld [vmem:[#allocation2 + $0x38] sm:$0xff]  ;;  %v65_v12 = vadd.f32 %v1061_v8, %v1045_v0  ;;  %v66_v13 = vadd.f32 %v1063_v9, %v1047_v1  ;;  %v67_v14 = vadd.f32 %v1065_v10, %v1049_v2  ;;  %v1077_v16 = vld [vmem:[#allocation5 + $0x20] sm:$0xff]  ;;  %v1079_v17 = vld [vmem:[#allocation5 + $0x28] sm:$0xff] }
  0x11   :  { %v68_v15 = vadd.f32 %v1067_v11, %v1051_v3  ;;  %v1081_v18 = vld [vmem:[#allocation5 + $0x30] sm:$0xff]  ;;  %v1083_v19 = vld [vmem:[#allocation5 + $0x38] sm:$0xff]  ;;  %v74_v20 = vadd.f32 %v1077_v16, %v1053_v4  ;;  %v75_v21 = vadd.f32 %v1079_v17, %v1055_v5  ;;  %v1091_v23 = vld [vmem:[#allocation2 + $0x40] sm:$0xff] }
  0x12   :  { %v76_v22 = vadd.f32 %v1081_v18, %v1057_v6  ;;  %v1093_v24 = vld [vmem:[#allocation2 + $0x48] sm:$0xff]  ;;  %v77_v25 = vadd.f32 %v1083_v19, %v1059_v7  ;;  %v1097_v26 = vld [vmem:[#allocation2 + $0x50] sm:$0xff]  ;;  %v1099_v27 = vld [vmem:[#allocation2 + $0x58] sm:$0xff]  ;;  %v83_v28 = vadd.f32 %v1091_v23, %v65_v12 }
  0x13   :  { %v84_v29 = vadd.f32 %v1093_v24, %v66_v13  ;;  %v1103_v30 = vld [vmem:[#allocation5 + $0x40] sm:$0xff]  ;;  %v85_v31 = vadd.f32 %v1097_v26, %v67_v14  ;;  %v86_v32 = vadd.f32 %v1099_v27, %v68_v15  ;;  %v1107_v33 = vld [vmem:[#allocation5 + $0x48] sm:$0xff]  ;;  %v1109_v34 = vld [vmem:[#allocation5 + $0x50] sm:$0xff] }
  0x14   :  { %v1111_v35 = vld [vmem:[#allocation5 + $0x58] sm:$0xff]  ;;  %v92_v36 = vadd.f32 %v1103_v30, %v74_v20  ;;  %v93_v37 = vadd.f32 %v1107_v33, %v75_v21  ;;  %v94_v38 = vadd.f32 %v1109_v34, %v76_v22  ;;  %v1117_v40 = vld [vmem:[#allocation2 + $0x60] sm:$0xff]  ;;  %v1119_v41 = vld [vmem:[#allocation2 + $0x68] sm:$0xff] }
  0x15   :  { %v95_v39 = vadd.f32 %v1111_v35, %v77_v25  ;;  %v1121_v42 = vld [vmem:[#allocation2 + $0x70] sm:$0xff]  ;;  %v1123_v43 = vld [vmem:[#allocation2 + $0x78] sm:$0xff]  ;;  %v101_v44 = vadd.f32 %v1117_v40, %v83_v28  ;;  %v102_v45 = vadd.f32 %v1119_v41, %v84_v29  ;;  %v1128_v47 = vld [vmem:[#allocation5 + $0x60] sm:$0xff] }
  0x16   :  { %v103_v46 = vadd.f32 %v1121_v42, %v85_v31  ;;  %v1130_v48 = vld [vmem:[#allocation5 + $0x68] sm:$0xff]  ;;  %v104_v49 = vadd.f32 %v1123_v43, %v86_v32  ;;  %v1133_v50 = vld [vmem:[#allocation5 + $0x70] sm:$0xff]  ;;  %v1135_v51 = vld [vmem:[#allocation5 + $0x78] sm:$0xff]  ;;  %v110_v52 = vadd.f32 %v1128_v47, %v92_v36 }
  0x17   :  { %v111_v53 = vadd.f32 %v1130_v48, %v93_v37  ;;  %v1139_v54 = vld [vmem:[#allocation2 + $0x80] sm:$0xff]  ;;  %v112_v55 = vadd.f32 %v1133_v50, %v94_v38  ;;  %v113_v56 = vadd.f32 %v1135_v51, %v95_v39  ;;  %v1143_v57 = vld [vmem:[#allocation2 + $0x88] sm:$0xff]  ;;  %v1145_v58 = vld [vmem:[#allocation2 + $0x90] sm:$0xff] }
  0x18   :  { %1987 = vst [vmem:[#allocation11_spill] sm:$0xff] %v1145_v58  ;;  %v1147_v59 = vld [vmem:[#allocation2 + $0x98] sm:$0xff]  ;;  %v119_v60 = vadd.f32 %v1139_v54, %v101_v44  ;;  %v120_v61 = vadd.f32 %v1143_v57, %v102_v45  ;;  %v121_v62 = vadd.f32 %v1145_v58, %v103_v46  ;;  %v1153_v12 = vld [vmem:[#allocation5 + $0x80] sm:$0xff]  ;;  %v1155_v13 = vld [vmem:[#allocation5 + $0x88] sm:$0xff] }
  0x19   :  { %1988 = vst [vmem:[#allocation12_spill] sm:$0xff] %v1147_v59  ;;  %v122_v63 = vadd.f32 %v1147_v59, %v104_v49  ;;  %v1157_v14 = vld [vmem:[#allocation5 + $0x90] sm:$0xff]  ;;  %v1159_v15 = vld [vmem:[#allocation5 + $0x98] sm:$0xff]  ;;  %v128_v20 = vadd.f32 %v1153_v12, %v110_v52  ;;  %v129_v21 = vadd.f32 %v1155_v13, %v111_v53  ;;  %v1164_v25 = vld [vmem:[#allocation2 + $0xa0] sm:$0xff] }
  0x1a   :  { %1989 = vst [vmem:[#allocation13_spill] sm:$0xff] %v1153_v12  ;;  %v130_v22 = vadd.f32 %v1157_v14, %v112_v55  ;;  %v1166_v28 = vld [vmem:[#allocation2 + $0xa8] sm:$0xff]  ;;  %v131_v29 = vadd.f32 %v1159_v15, %v113_v56  ;;  %v1169_v31 = vld [vmem:[#allocation2 + $0xb0] sm:$0xff]  ;;  %v1171_v32 = vld [vmem:[#allocation2 + $0xb8] sm:$0xff]  ;;  %v137_v36 = vadd.f32 %v1164_v25, %v119_v60 }
  0x1b   :  { %1990 = vst [vmem:[#allocation14_spill] sm:$0xff] %v1155_v13  ;;  %v138_v37 = vadd.f32 %v1166_v28, %v120_v61  ;;  %v1175_v38 = vld [vmem:[#allocation5 + $0xa0] sm:$0xff]  ;;  %v139_v39 = vadd.f32 %v1169_v31, %v121_v62  ;;  %v140_v44 = vadd.f32 %v1171_v32, %v122_v63  ;;  %v1179_v45 = vld [vmem:[#allocation5 + $0xa8] sm:$0xff]  ;;  %v1181_v46 = vld [vmem:[#allocation5 + $0xb0] sm:$0xff] }
  0x1c   :  { %1991 = vst [vmem:[#allocation15_spill] sm:$0xff] %v1157_v14  ;;  %v1183_v49 = vld [vmem:[#allocation5 + $0xb8] sm:$0xff]  ;;  %v146_v52 = vadd.f32 %v1175_v38, %v128_v20  ;;  %v147_v53 = vadd.f32 %v1179_v45, %v129_v21  ;;  %v148_v55 = vadd.f32 %v1181_v46, %v130_v22  ;;  %v1189_v60 = vld [vmem:[#allocation2 + $0xc0] sm:$0xff]  ;;  %v1191_v61 = vld [vmem:[#allocation2 + $0xc8] sm:$0xff] }
  0x1d   :  { %1992 = vst [vmem:[#allocation16_spill] sm:$0xff] %v1159_v15  ;;  %v149_v56 = vadd.f32 %v1183_v49, %v131_v29  ;;  %v1193_v62 = vld [vmem:[#allocation2 + $0xd0] sm:$0xff]  ;;  %v1195_v63 = vld [vmem:[#allocation2 + $0xd8] sm:$0xff]  ;;  %v1202_v21 = vld [vmem:[#allocation5 + $0xc8] sm:$0xff] }
  0x1e   :  { %1993 = vst [vmem:[#allocation17_spill] sm:$0xff] %v1164_v25  ;;  %v157_v20 = vadd.f32 %v1193_v62, %v139_v39  ;;  %v158_v22 = vadd.f32 %v1195_v63, %v140_v44  ;;  %v1205_v29 = vld [vmem:[#allocation5 + $0xd0] sm:$0xff]  ;;  %v1215_v39 = vld [vmem:[#allocation2 + $0xe8] sm:$0xff] }
  0x1f   :  { %1994 = vst [vmem:[#allocation18_spill] sm:$0xff] %v1166_v28  ;;  %v1211_v28 = vld [vmem:[#allocation2 + $0xe0] sm:$0xff]  ;;  %v1395_v15 = vld [vmem:[#allocation5 + $0x1d0] sm:$0xff] }
  0x20   :  { %1995 = vst [vmem:[#allocation19_spill] sm:$0xff] %v1169_v31  ;;  %v156_v31 = vadd.f32 %v1191_v61, %v138_v37 }
  0x21   :  { %1996 = vst [vmem:[#allocation20_spill] sm:$0xff] %v1171_v32  ;;  %v155_v32 = vadd.f32 %v1189_v60, %v137_v36  ;;  %v166_v36 = vadd.f32 %v1205_v29, %v148_v55  ;;  %v1229_v55 = vld [vmem:[#allocation5 + $0xf0] sm:$0xff] }
  0x22   :  { %1997 = vst [vmem:[#allocation21_spill] sm:$0xff] %v1175_v38  ;;  %v1200_v38 = vld [vmem:[#allocation5 + $0xc0] sm:$0xff] }
  0x23   :  { %1998 = vst [vmem:[#allocation22_spill] sm:$0xff] %v1179_v45  ;;  %v165_v45 = vadd.f32 %v1202_v21, %v147_v53  ;;  %v173_v44 = vadd.f32 %v1211_v28, %v155_v32  ;;  %v184_v32 = vadd.f32 %v1229_v55, %v166_v36  ;;  %v1251_v36 = vld [vmem:[#allocation5 + $0x108] sm:$0xff] }
  0x24   :  { %1999 = vst [vmem:[#allocation23_spill] sm:$0xff] %v1181_v46  ;;  %v164_v46 = vadd.f32 %v1200_v38, %v146_v52 }
  0x25   :  { %2000 = vst [vmem:[#allocation24_spill] sm:$0xff] %v1183_v49  ;;  %v1207_v49 = vld [vmem:[#allocation5 + $0xd8] sm:$0xff] }
  0x26   :  { %2001 = vst [vmem:[#allocation25_spill] sm:$0xff] %v1189_v60  ;;  %v167_v37 = vadd.f32 %v1207_v49, %v149_v56  ;;  %v1231_v56 = vld [vmem:[#allocation5 + $0xf8] sm:$0xff]  ;;  %v1247_v60 = vld [vmem:[#allocation5 + $0x100] sm:$0xff] }
  0x27   :  { %2002 = vst [vmem:[#allocation26_spill] sm:$0xff] %v1191_v61  ;;  %v1219_v61 = vld [vmem:[#allocation2 + $0xf8] sm:$0xff] }
  0x28   :  { %2003 = vst [vmem:[#allocation27_spill] sm:$0xff] %v1193_v62  ;;  %v1217_v62 = vld [vmem:[#allocation2 + $0xf0] sm:$0xff]  ;;  %v176_v53 = vadd.f32 %v1219_v61, %v158_v22 }
  0x29   :  { %2004 = vst [vmem:[#allocation28_spill] sm:$0xff] %v1195_v63  ;;  %v174_v63 = vadd.f32 %v1215_v39, %v156_v31  ;;  %v175_v52 = vadd.f32 %v1217_v62, %v157_v20  ;;  %v1238_v31 = vld [vmem:[#allocation2 + $0x108] sm:$0xff]  ;;  %v185_v20 = vadd.f32 %v1231_v56, %v167_v37  ;;  %v1241_v22 = vld [vmem:[#allocation2 + $0x110] sm:$0xff] }
  0x2a   :  { %2005 = vst [vmem:[#allocation29_spill] sm:$0xff] %v1200_v38  ;;  %v1227_v38 = vld [vmem:[#allocation5 + $0xe8] sm:$0xff] }
  0x2b   :  { %2006 = vst [vmem:[#allocation30_spill] sm:$0xff] %v1202_v21  ;;  %v1225_v21 = vld [vmem:[#allocation5 + $0xe0] sm:$0xff] }
  0x2c   :  { %2007 = vst [vmem:[#allocation31_spill] sm:$0xff] %v1205_v29  ;;  %v183_v29 = vadd.f32 %v1227_v38, %v165_v45  ;;  %v193_v45 = vadd.f32 %v1241_v22, %v175_v52  ;;  %v1265_v52 = vld [vmem:[#allocation2 + $0x130] sm:$0xff] }
  0x2d   :  { %2008 = vst [vmem:[#allocation32_spill] sm:$0xff] %v1207_v49  ;;  %v182_v49 = vadd.f32 %v1225_v21, %v164_v46 }
  0x2e   :  { %2009 = vst [vmem:[#allocation33_spill] sm:$0xff] %v1211_v28  ;;  %v1236_v28 = vld [vmem:[#allocation2 + $0x100] sm:$0xff] }
  0x2f   :  { %2010 = vst [vmem:[#allocation34_spill] sm:$0xff] %v1215_v39  ;;  %v192_v39 = vadd.f32 %v1238_v31, %v174_v63  ;;  %v200_v37 = vadd.f32 %v1247_v60, %v182_v49  ;;  %v211_v49 = vadd.f32 %v1265_v52, %v193_v45  ;;  %v1287_v45 = vld [vmem:[#allocation2 + $0x148] sm:$0xff] }
  0x30   :  { %2011 = vst [vmem:[#allocation35_spill] sm:$0xff] %v1217_v62  ;;  %v191_v62 = vadd.f32 %v1236_v28, %v173_v44 }
  0x31   :  { %2012 = vst [vmem:[#allocation36_spill] sm:$0xff] %v1219_v61  ;;  %v1243_v61 = vld [vmem:[#allocation2 + $0x118] sm:$0xff] }
  0x32   :  { %2013 = vst [vmem:[#allocation37_spill] sm:$0xff] %v1225_v21  ;;  %v194_v46 = vadd.f32 %v1243_v61, %v176_v53  ;;  %v1267_v53 = vld [vmem:[#allocation2 + $0x138] sm:$0xff]  ;;  %v1283_v21 = vld [vmem:[#allocation2 + $0x140] sm:$0xff] }
  0x33   :  { %2014 = vst [vmem:[#allocation38_spill] sm:$0xff] %v1227_v38  ;;  %v1255_v38 = vld [vmem:[#allocation5 + $0x118] sm:$0xff] }
  0x34   :  { %2015 = vst [vmem:[#allocation39_spill] sm:$0xff] %v1229_v55  ;;  %v1253_v55 = vld [vmem:[#allocation5 + $0x110] sm:$0xff]  ;;  %v203_v63 = vadd.f32 %v1255_v38, %v185_v20 }
  0x35   :  { %2016 = vst [vmem:[#allocation40_spill] sm:$0xff] %v1231_v56  ;;  %v201_v56 = vadd.f32 %v1251_v36, %v183_v29  ;;  %v202_v44 = vadd.f32 %v1253_v55, %v184_v32  ;;  %v1274_v29 = vld [vmem:[#allocation5 + $0x128] sm:$0xff]  ;;  %v212_v32 = vadd.f32 %v1267_v53, %v194_v46  ;;  %v1277_v20 = vld [vmem:[#allocation5 + $0x130] sm:$0xff] }
  0x36   :  { %2017 = vst [vmem:[#allocation41_spill] sm:$0xff] %v1236_v28  ;;  %v1263_v28 = vld [vmem:[#allocation2 + $0x128] sm:$0xff] }
  0x37   :  { %2018 = vst [vmem:[#allocation42_spill] sm:$0xff] %v1238_v31  ;;  %v1261_v31 = vld [vmem:[#allocation2 + $0x120] sm:$0xff] }
  0x38   :  { %2019 = vst [vmem:[#allocation43_spill] sm:$0xff] %v1241_v22  ;;  %v210_v22 = vadd.f32 %v1263_v28, %v192_v39 }
  0x39   :  { %2020 = vst [vmem:[#allocation44_spill] sm:$0xff] %v1243_v61  ;;  %v209_v61 = vadd.f32 %v1261_v31, %v191_v62  ;;  %v220_v62 = vadd.f32 %v1277_v20, %v202_v44  ;;  %v1301_v44 = vld [vmem:[#allocation5 + $0x150] sm:$0xff] }
  0x3a   :  { %2021 = vst [vmem:[#allocation45_spill] sm:$0xff] %v1247_v60  ;;  %v1272_v60 = vld [vmem:[#allocation5 + $0x120] sm:$0xff] }
  0x3b   :  { %2022 = vst [vmem:[#allocation46_spill] sm:$0xff] %v1251_v36  ;;  %v219_v36 = vadd.f32 %v1274_v29, %v201_v56  ;;  %v227_v46 = vadd.f32 %v1283_v21, %v209_v61  ;;  %v238_v61 = vadd.f32 %v1301_v44, %v220_v62  ;;  %v1323_v62 = vld [vmem:[#allocation5 + $0x168] sm:$0xff] }
  0x3c   :  { %2023 = vst [vmem:[#allocation47_spill] sm:$0xff] %v1253_v55  ;;  %v218_v55 = vadd.f32 %v1272_v60, %v200_v37 }
  0x3d   :  { %2024 = vst [vmem:[#allocation48_spill] sm:$0xff] %v1255_v38  ;;  %v1279_v38 = vld [vmem:[#allocation5 + $0x138] sm:$0xff] }
  0x3e   :  { %2025 = vst [vmem:[#allocation49_spill] sm:$0xff] %v1261_v31  ;;  %v221_v39 = vadd.f32 %v1279_v38, %v203_v63  ;;  %v1303_v63 = vld [vmem:[#allocation5 + $0x158] sm:$0xff]  ;;  %v1319_v31 = vld [vmem:[#allocation5 + $0x160] sm:$0xff] }
  0x3f   :  { %2026 = vst [vmem:[#allocation50_spill] sm:$0xff] %v1263_v28  ;;  %v1291_v28 = vld [vmem:[#allocation2 + $0x158] sm:$0xff] }
  0x40   :  { %2027 = vst [vmem:[#allocation51_spill] sm:$0xff] %v1265_v52  ;;  %v1289_v52 = vld [vmem:[#allocation2 + $0x150] sm:$0xff]  ;;  %v230_v56 = vadd.f32 %v1291_v28, %v212_v32 }
  0x41   :  { %2028 = vst [vmem:[#allocation52_spill] sm:$0xff] %v1267_v53  ;;  %v228_v53 = vadd.f32 %v1287_v45, %v210_v22  ;;  %v229_v37 = vadd.f32 %v1289_v52, %v211_v49  ;;  %v1310_v22 = vld [vmem:[#allocation2 + $0x168] sm:$0xff]  ;;  %v239_v49 = vadd.f32 %v1303_v63, %v221_v39  ;;  %v1313_v32 = vld [vmem:[#allocation2 + $0x170] sm:$0xff] }
  0x42   :  { %2029 = vst [vmem:[#allocation53_spill] sm:$0xff] %v1272_v60  ;;  %v1299_v60 = vld [vmem:[#allocation5 + $0x148] sm:$0xff] }
  0x43   :  { %2030 = vst [vmem:[#allocation54_spill] sm:$0xff] %v1274_v29  ;;  %v1297_v29 = vld [vmem:[#allocation5 + $0x140] sm:$0xff] }
  0x44   :  { %2031 = vst [vmem:[#allocation55_spill] sm:$0xff] %v1277_v20  ;;  %v237_v20 = vadd.f32 %v1299_v60, %v219_v36 }
  0x45   :  { %2032 = vst [vmem:[#allocation56_spill] sm:$0xff] %v1279_v38  ;;  %v236_v38 = vadd.f32 %v1297_v29, %v218_v55  ;;  %v247_v55 = vadd.f32 %v1313_v32, %v229_v37  ;;  %v1337_v37 = vld [vmem:[#allocation2 + $0x190] sm:$0xff] }
  0x46   :  { %2033 = vst [vmem:[#allocation57_spill] sm:$0xff] %v1283_v21  ;;  %v1308_v21 = vld [vmem:[#allocation2 + $0x160] sm:$0xff] }
  0x47   :  { %2034 = vst [vmem:[#allocation58_spill] sm:$0xff] %v1287_v45  ;;  %v246_v45 = vadd.f32 %v1310_v22, %v228_v53  ;;  %v254_v39 = vadd.f32 %v1319_v31, %v236_v38  ;;  %v265_v38 = vadd.f32 %v1337_v37, %v247_v55  ;;  %v1359_v55 = vld [vmem:[#allocation2 + $0x1a8] sm:$0xff] }
  0x48   :  { %2035 = vst [vmem:[#allocation59_spill] sm:$0xff] %v1289_v52  ;;  %v245_v52 = vadd.f32 %v1308_v21, %v227_v46 }
  0x49   :  { %2036 = vst [vmem:[#allocation60_spill] sm:$0xff] %v1291_v28  ;;  %v1315_v28 = vld [vmem:[#allocation2 + $0x178] sm:$0xff] }
  0x4a   :  { %2037 = vst [vmem:[#allocation61_spill] sm:$0xff] %v1297_v29  ;;  %v248_v36 = vadd.f32 %v1315_v28, %v230_v56  ;;  %v1339_v56 = vld [vmem:[#allocation2 + $0x198] sm:$0xff]  ;;  %v1355_v29 = vld [vmem:[#allocation2 + $0x1a0] sm:$0xff] }
  0x4b   :  { %2038 = vst [vmem:[#allocation62_spill] sm:$0xff] %v1299_v60  ;;  %v1327_v60 = vld [vmem:[#allocation5 + $0x178] sm:$0xff] }
  0x4c   :  { %2039 = vst [vmem:[#allocation63_spill] sm:$0xff] %v1301_v44  ;;  %v1325_v44 = vld [vmem:[#allocation5 + $0x170] sm:$0xff]  ;;  %v257_v53 = vadd.f32 %v1327_v60, %v239_v49 }
  0x4d   :  { %2040 = vst [vmem:[#allocation64_spill] sm:$0xff] %v1303_v63  ;;  %v255_v63 = vadd.f32 %v1323_v62, %v237_v20  ;;  %v256_v46 = vadd.f32 %v1325_v44, %v238_v61  ;;  %v1346_v20 = vld [vmem:[#allocation5 + $0x188] sm:$0xff]  ;;  %v266_v61 = vadd.f32 %v1339_v56, %v248_v36  ;;  %v1349_v49 = vld [vmem:[#allocation5 + $0x190] sm:$0xff] }
  0x4e   :  { %2041 = vst [vmem:[#allocation65_spill] sm:$0xff] %v1308_v21  ;;  %v1335_v21 = vld [vmem:[#allocation2 + $0x188] sm:$0xff] }
  0x4f   :  { %2042 = vst [vmem:[#allocation66_spill] sm:$0xff] %v1310_v22  ;;  %v1333_v22 = vld [vmem:[#allocation2 + $0x180] sm:$0xff] }
  0x50   :  { %2043 = vst [vmem:[#allocation67_spill] sm:$0xff] %v1313_v32  ;;  %v264_v32 = vadd.f32 %v1335_v21, %v246_v45 }
  0x51   :  { %2044 = vst [vmem:[#allocation68_spill] sm:$0xff] %v1315_v28  ;;  %v263_v28 = vadd.f32 %v1333_v22, %v245_v52  ;;  %v274_v52 = vadd.f32 %v1349_v49, %v256_v46 }
  0x52   :  { %2045 = vst [vmem:[#allocation69_spill] sm:$0xff] %v1319_v31  ;;  %v1344_v31 = vld [vmem:[#allocation5 + $0x180] sm:$0xff] }
  0x53   :  { %2046 = vst [vmem:[#allocation70_spill] sm:$0xff] %v1323_v62  ;;  %v273_v62 = vadd.f32 %v1346_v20, %v255_v63  ;;  %v281_v36 = vadd.f32 %v1355_v29, %v263_v28  ;;  %v1371_v63 = vld [vmem:[#allocation5 + $0x1b0] sm:$0xff] }
  0x54   :  { %2047 = vst [vmem:[#allocation71_spill] sm:$0xff] %v1325_v44  ;;  %v272_v44 = vadd.f32 %v1344_v31, %v254_v39  ;;  %v1369_v39 = vld [vmem:[#allocation5 + $0x1a8] sm:$0xff] }
  0x55   :  { %2048 = vst [vmem:[#allocation72_spill] sm:$0xff] %v1327_v60  ;;  %v1351_v60 = vld [vmem:[#allocation5 + $0x198] sm:$0xff] }
  0x56   :  { %2049 = vst [vmem:[#allocation73_spill] sm:$0xff] %v1333_v22  ;;  %v275_v45 = vadd.f32 %v1351_v60, %v257_v53  ;;  %v1367_v22 = vld [vmem:[#allocation5 + $0x1a0] sm:$0xff] }
  0x57   :  { %2050 = vst [vmem:[#allocation74_spill] sm:$0xff] %v1335_v21  ;;  %v1363_v21 = vld [vmem:[#allocation2 + $0x1b8] sm:$0xff]  ;;  %v290_v28 = vadd.f32 %v1367_v22, %v272_v44 }
  0x58   :  { %2051 = vst [vmem:[#allocation75_spill] sm:$0xff] %v1337_v37  ;;  %v1361_v37 = vld [vmem:[#allocation2 + $0x1b0] sm:$0xff]  ;;  %v284_v53 = vadd.f32 %v1363_v21, %v266_v61  ;;  %v1391_v61 = vld [vmem:[#allocation5 + $0x1c8] sm:$0xff]  ;;  %v1397_v44 = vld [vmem:[#allocation5 + $0x1d8] sm:$0xff] }
  0x59   :  { %2052 = vst [vmem:[#allocation76_spill] sm:$0xff] %v1339_v56  ;;  %v282_v56 = vadd.f32 %v1359_v55, %v264_v32  ;;  %v283_v46 = vadd.f32 %v1361_v37, %v265_v38  ;;  %v291_v32 = vadd.f32 %v1369_v39, %v273_v62 }
  0x5a   :  { %2053 = vst [vmem:[#allocation77_spill] sm:$0xff] %v1344_v31  ;;  %v292_v31 = vadd.f32 %v1371_v63, %v274_v52  ;;  %v1403_v52 = vld [vmem:[#allocation2 + $0x1e8] sm:$0xff] }
  0x5b   :  { %2054 = vst [vmem:[#allocation78_spill] sm:$0xff] %v1346_v20  ;;  %v1379_v20 = vld [vmem:[#allocation2 + $0x1c8] sm:$0xff] }
  0x5c   :  { %2055 = vst [vmem:[#allocation79_spill] sm:$0xff] %v1349_v49  ;;  %v1377_v49 = vld [vmem:[#allocation2 + $0x1c0] sm:$0xff]  ;;  %v300_v25 = vadd.f32 %v1379_v20, %v282_v56  ;;  %v310_v56 = vadd.f32 %v1395_v15, %v292_v31 }
  0x5d   :  { %2056 = vst [vmem:[#allocation80_spill] sm:$0xff] %v1351_v60  ;;  %v1375_v60 = vld [vmem:[#allocation5 + $0x1b8] sm:$0xff] }
  0x5e   :  { %2057 = vst [vmem:[#allocation81_spill] sm:$0xff] %v1355_v29  ;;  %v1385_v29 = vld [vmem:[#allocation2 + $0x1d8] sm:$0xff]  ;;  %v293_v38 = vadd.f32 %v1375_v60, %v275_v45 }
  0x5f   :  { %2058 = vst [vmem:[#allocation82_spill] sm:$0xff] %v1359_v55  ;;  %v1383_v55 = vld [vmem:[#allocation2 + $0x1d0] sm:$0xff] }
  0x60   :  { %2059 = vst [vmem:[#allocation83_spill] sm:$0xff] %v1361_v37  ;;  %v1389_v37 = vld [vmem:[#allocation5 + $0x1c0] sm:$0xff]  ;;  %v301_v62 = vadd.f32 %v1383_v55, %v283_v46  ;;  %v1415_v46 = vld [vmem:[#allocation5 + $0x1e8] sm:$0xff] }
  0x61   :  { %2060 = vst [vmem:[#allocation84_spill] sm:$0xff] %v1363_v21  ;;  %v299_v21 = vadd.f32 %v1377_v49, %v281_v36  ;;  %v308_v45 = vadd.f32 %v1389_v37, %v290_v28  ;;  %v1409_v36 = vld [vmem:[#allocation2 + $0x1f8] sm:$0xff] }
  0x62   :  { %2061 = vst [vmem:[#allocation85_spill] sm:$0xff] %v1367_v22  ;;  %v1401_v22 = vld [vmem:[#allocation2 + $0x1e0] sm:$0xff]  ;;  %v1421_v28 = vld [vmem:[#allocation5 + $0x1f8] sm:$0xff] }
  0x63   :  { %2062 = vst [vmem:[#allocation86_spill] sm:$0xff] %v1369_v39  ;;  %v302_v39 = vadd.f32 %v1385_v29, %v284_v53  ;;  %v317_v53 = vadd.f32 %v1401_v22, %v299_v21 }
  0x64   :  { %2063 = vst [vmem:[#allocation87_spill] sm:$0xff] %v1371_v63  ;;  %v1407_v63 = vld [vmem:[#allocation2 + $0x1f0] sm:$0xff] }
  0x65   :  { %2064 = vst [vmem:[#allocation88_spill] sm:$0xff] %v1375_v60  ;;  %v309_v60 = vadd.f32 %v1391_v61, %v291_v32  ;;  %v319_v32 = vadd.f32 %v1407_v63, %v301_v62 }
  0x66   :  { %2065 = vst [vmem:[#allocation89_spill] sm:$0xff] %v1377_v49  ;;  %v1413_v49 = vld [vmem:[#allocation5 + $0x1e0] sm:$0xff] }
  0x67   :  { %2066 = vst [vmem:[#allocation90_spill] sm:$0xff] %v1379_v20  ;;  %v311_v20 = vadd.f32 %v1397_v44, %v293_v38  ;;  %v326_v31 = vadd.f32 %v1413_v49, %v308_v45  ;;  %v327_v38 = vadd.f32 %v1415_v46, %v309_v60 }
  0x68   :  { %2067 = vst [vmem:[#allocation91_spill] sm:$0xff] %v1383_v55  ;;  %v1419_v55 = vld [vmem:[#allocation5 + $0x1f0] sm:$0xff] }
  0x69   :  { %2068 = vst [vmem:[#allocation92_spill] sm:$0xff] %v1385_v29  ;;  %v318_v29 = vadd.f32 %v1403_v52, %v300_v25  ;;  %v1433_v25 = vmul.f32 0.0625, %v319_v32  ;;  %v1439_v62 = vmul.f32 0.0625, %v327_v38 }
  0x6a   :  { %2069 = vst [vmem:[#allocation93_spill] sm:$0xff] %v1389_v37  ;;  %v1429_v37 = vmul.f32 0.0625, %v317_v53 }
  0x6b   :  { %2070 = vst [vmem:[#allocation94_spill] sm:$0xff] %v1391_v61  ;;  %v320_v61 = vadd.f32 %v1409_v36, %v302_v39  ;;  %v1431_v21 = vmul.f32 0.0625, %v318_v29  ;;  %v340_v29 = vsub.f32 %v1049_v2, %v1433_v25 }
  0x6c   :  { %2071 = vst [vmem:[#allocation95_spill] sm:$0xff] %v1395_v15  ;;  %v329_v15 = vadd.f32 %v1421_v28, %v311_v20  ;;  %v338_v60 = vsub.f32 %v1045_v0, %v1429_v37 }
  0x6d   :  { %2072 = vst [vmem:[#allocation96_spill] sm:$0xff] %v1397_v44  ;;  %v328_v44 = vadd.f32 %v1419_v55, %v310_v56  ;;  %v339_v20 = vsub.f32 %v1047_v1, %v1431_v21  ;;  %v371_v0 = vsub.f32 %v1063_v9, %v1431_v21  ;;  %v375_v9 = vsub.f32 %v1079_v17, %v1439_v62 }
  0x6e   :  { %2073 = vst [vmem:[#allocation97_spill] sm:$0xff] %v1401_v22  ;;  %v1437_v22 = vmul.f32 0.0625, %v326_v31  ;;  %v1443_v45 = vmul.f32 0.0625, %v329_v15  ;;  %v370_v15 = vsub.f32 %v1061_v8, %v1429_v37  ;;  %v354_v32 = vmul.f32 %v338_v60, %v338_v60 }
  0x6f   :  { %2074 = vst [vmem:[#allocation98_spill] sm:$0xff] %v1403_v52  ;;  %v1435_v52 = vmul.f32 0.0625, %v320_v61  ;;  %v1441_v39 = vmul.f32 0.0625, %v328_v44  ;;  %v343_v44 = vsub.f32 %v1055_v5, %v1439_v62  ;;  %v355_v31 = vmul.f32 %v339_v20, %v339_v20 }
  0x70   :  { %2075 = vst [vmem:[#allocation99_spill] sm:$0xff] %v1407_v63  ;;  %v342_v56 = vsub.f32 %v1053_v4, %v1437_v22  ;;  %v345_v2 = vsub.f32 %v1059_v7, %v1443_v45  ;;  %v372_v4 = vsub.f32 %v1065_v10, %v1433_v25  ;;  %v374_v8 = vsub.f32 %v1077_v16, %v1437_v22 }
  0x71   :  { %2076 = vst [vmem:[#allocation100_spill] sm:$0xff] %v1409_v36  ;;  %v341_v61 = vsub.f32 %v1051_v3, %v1435_v52  ;;  %v344_v1 = vsub.f32 %v1057_v6, %v1441_v39  ;;  %v347_v3 = vmul.f32 %v343_v44, %v339_v20  ;;  %v373_v5 = vsub.f32 %v1067_v11, %v1435_v52 }
  0x72   :  { %2077 = vst [vmem:[#allocation101_spill] sm:$0xff] %v1413_v49  ;;  %v346_v53 = vmul.f32 %v342_v56, %v338_v60  ;;  %v356_v6 = vmul.f32 %v340_v29, %v340_v29  ;;  %v387_v7 = vmul.f32 %v371_v0, %v371_v0  ;;  %v378_v60 = vmul.f32 %v374_v8, %v370_v15 }
  0x73   :  { %2078 = vst [vmem:[#allocation102_spill] sm:$0xff] %v1415_v46  ;;  %v357_v38 = vmul.f32 %v341_v61, %v341_v61  ;;  %v349_v46 = vmul.f32 %v345_v2, %v341_v61  ;;  %v379_v20 = vmul.f32 %v375_v9, %v371_v0  ;;  %v362_v49 = vmul.f32 %v342_v56, %v342_v56 }
  0x74   :  { %2079 = vst [vmem:[#allocation103_spill] sm:$0xff] %v1419_v55  ;;  %v348_v55 = vmul.f32 %v344_v1, %v340_v29  ;;  %v363_v36 = vmul.f32 %v343_v44, %v343_v44  ;;  %v376_v10 = vsub.f32 %v1081_v18, %v1441_v39  ;;  %v377_v11 = vsub.f32 %v1083_v19, %v1443_v45 }
  0x75   :  { %2080 = vst [vmem:[#allocation104_spill] sm:$0xff] %v1421_v28  ;;  %v386_v28 = vmul.f32 %v370_v15, %v370_v15  ;;  %v364_v16 = vmul.f32 %v344_v1, %v344_v1  ;;  %v365_v63 = vmul.f32 %v345_v2, %v345_v2  ;;  %v388_v14 = vmul.f32 %v372_v4, %v372_v4 }
  0x76   :  { %v389_v17 = vmul.f32 %v373_v5, %v373_v5  ;;  %v380_v13 = vmul.f32 %v376_v10, %v372_v4  ;;  %v381_v12 = vmul.f32 %v377_v11, %v373_v5  ;;  %v391_v58 = vadd.f32 %v387_v7, %v355_v31 }
  0x77   :  { %v390_v59 = vadd.f32 %v386_v28, %v354_v32  ;;  %v382_v29 = vadd.f32 %v378_v60, %v346_v53  ;;  %v383_v61 = vadd.f32 %v379_v20, %v347_v3  ;;  %v402_v56 = vsub.f32 %v1091_v23, %v1429_v37 }
  0x78   :  { %v403_v44 = vsub.f32 %v1093_v24, %v1431_v21  ;;  %v394_v18 = vmul.f32 %v374_v8, %v374_v8  ;;  %v395_v15 = vmul.f32 %v375_v9, %v375_v9  ;;  %v396_v0 = vmul.f32 %v376_v10, %v376_v10 }
  0x79   :  { %v397_v19 = vmul.f32 %v377_v11, %v377_v11  ;;  %v404_v1 = vsub.f32 %v1097_v26, %v1433_v25  ;;  %v405_v2 = vsub.f32 %v1099_v27, %v1435_v52  ;;  %v406_v28 = vsub.f32 %v1103_v30, %v1437_v22 }
  0x7a   :  { %v407_v53 = vsub.f32 %v1107_v33, %v1439_v62  ;;  %v384_v23 = vadd.f32 %v380_v13, %v348_v55  ;;  %v385_v3 = vadd.f32 %v381_v12, %v349_v46  ;;  %v392_v32 = vadd.f32 %v388_v14, %v356_v6 }
  0x7b   :  { %v393_v24 = vadd.f32 %v389_v17, %v357_v38  ;;  %v410_v31 = vmul.f32 %v406_v28, %v402_v56  ;;  %v418_v5 = vmul.f32 %v402_v56, %v402_v56  ;;  %v419_v8 = vmul.f32 %v403_v44, %v403_v44 }
  0x7c   :  { %v411_v4 = vmul.f32 %v407_v53, %v403_v44  ;;  %v398_v9 = vadd.f32 %v394_v18, %v362_v49  ;;  %v399_v7 = vadd.f32 %v395_v15, %v363_v36  ;;  %v408_v26 = vsub.f32 %v1109_v34, %v1441_v39 }
  0x7d   :  { %v409_v27 = vsub.f32 %v1111_v35, %v1443_v45  ;;  %v400_v30 = vadd.f32 %v396_v0, %v364_v16  ;;  %v401_v60 = vadd.f32 %v397_v19, %v365_v63  ;;  %v420_v20 = vmul.f32 %v404_v1, %v404_v1 }
  0x7e   :  { %v421_v33 = vmul.f32 %v405_v2, %v405_v2  ;;  %v412_v13 = vmul.f32 %v408_v26, %v404_v1  ;;  %v434_v14 = vsub.f32 %v1117_v40, %v1429_v37  ;;  %v435_v55 = vsub.f32 %v1119_v41, %v1431_v21 }
  0x7f   :  { %v413_v12 = vmul.f32 %v409_v27, %v405_v2  ;;  %v414_v49 = vadd.f32 %v410_v31, %v382_v29  ;;  %v415_v36 = vadd.f32 %v411_v4, %v383_v61  ;;  %v422_v46 = vadd.f32 %v418_v5, %v390_v59  ;;  %v2081_v5 = vld [vmem:[#allocation11_spill] sm:$0xff] }
  0x80   :  { %v423_v6 = vadd.f32 %v419_v8, %v391_v58  ;;  %v426_v34 = vmul.f32 %v406_v28, %v406_v28  ;;  %v427_v38 = vmul.f32 %v407_v53, %v407_v53  ;;  %v428_v10 = vmul.f32 %v408_v26, %v408_v26  ;;  %v2083_v26 = vld [vmem:[#allocation13_spill] sm:$0xff] }
  0x81   :  { %v429_v35 = vmul.f32 %v409_v27, %v409_v27  ;;  %v436_v63 = vsub.f32 %v1121_v42, %v1433_v25  ;;  %v437_v11 = vsub.f32 %v1123_v43, %v1435_v52  ;;  %v438_v40 = vsub.f32 %v1128_v47, %v1437_v22 }
  0x82   :  { %v439_v41 = vsub.f32 %v1130_v48, %v1439_v62  ;;  %v424_v16 = vadd.f32 %v420_v20, %v392_v32  ;;  %v425_v17 = vadd.f32 %v421_v33, %v393_v24  ;;  %v450_v59 = vmul.f32 %v434_v14, %v434_v14 }
  0x83   :  { %v451_v58 = vmul.f32 %v435_v55, %v435_v55  ;;  %v416_v29 = vadd.f32 %v412_v13, %v384_v23  ;;  %v417_v61 = vadd.f32 %v413_v12, %v385_v3  ;;  %v442_v56 = vmul.f32 %v438_v40, %v434_v14 }
  0x84   :  { %v443_v44 = vmul.f32 %v439_v41, %v435_v55  ;;  %v430_v18 = vadd.f32 %v426_v34, %v398_v9  ;;  %v431_v15 = vadd.f32 %v427_v38, %v399_v7  ;;  %v440_v42 = vsub.f32 %v1133_v50, %v1441_v39  ;;  %v2082_v9 = vld [vmem:[#allocation12_spill] sm:$0xff] }
  0x85   :  { %v441_v43 = vsub.f32 %v1135_v51, %v1443_v45  ;;  %v432_v47 = vadd.f32 %v428_v10, %v400_v30  ;;  %v433_v0 = vadd.f32 %v429_v35, %v401_v60  ;;  %v452_v19 = vmul.f32 %v436_v63, %v436_v63  ;;  %v2084_v30 = vld [vmem:[#allocation14_spill] sm:$0xff]  ;;  %v2086_v34 = vld [vmem:[#allocation16_spill] sm:$0xff] }
  0x86   :  { %v453_v48 = vmul.f32 %v437_v11, %v437_v11  ;;  %v444_v1 = vmul.f32 %v440_v42, %v436_v63  ;;  %v454_v28 = vadd.f32 %v450_v59, %v422_v46  ;;  %v455_v53 = vadd.f32 %v451_v58, %v423_v6  ;;  %v2085_v46 = vld [vmem:[#allocation15_spill] sm:$0xff]  ;;  %v2088_v59 = vld [vmem:[#allocation18_spill] sm:$0xff] }
  0x87   :  { %v445_v2 = vmul.f32 %v441_v43, %v437_v11  ;;  %v446_v23 = vadd.f32 %v442_v56, %v414_v49  ;;  %v447_v3 = vadd.f32 %v443_v44, %v415_v36  ;;  %v466_v32 = vsub.f32 %v1139_v54, %v1429_v37 }
  0x88   :  { %v467_v24 = vsub.f32 %v1143_v57, %v1431_v21  ;;  %v458_v50 = vmul.f32 %v438_v40, %v438_v40  ;;  %v459_v31 = vmul.f32 %v439_v41, %v439_v41  ;;  %v460_v4 = vmul.f32 %v440_v42, %v440_v42 }
  0x89   :  { %v461_v51 = vmul.f32 %v441_v43, %v441_v43  ;;  %v468_v8 = vsub.f32 %v2081_v5, %v1433_v25  ;;  %v469_v7 = vsub.f32 %v2082_v9, %v1435_v52  ;;  %v470_v27 = vsub.f32 %v2083_v26, %v1437_v22  ;;  %v2093_v9 = vld [vmem:[#allocation23_spill] sm:$0xff]  ;;  %v2094_v26 = vld [vmem:[#allocation24_spill] sm:$0xff] }
  0x8a   :  { %v471_v60 = vsub.f32 %v2084_v30, %v1439_v62  ;;  %v448_v54 = vadd.f32 %v444_v1, %v416_v29  ;;  %v449_v20 = vadd.f32 %v445_v2, %v417_v61  ;;  %v456_v33 = vadd.f32 %v452_v19, %v424_v16  ;;  %v2087_v16 = vld [vmem:[#allocation17_spill] sm:$0xff]  ;;  %v2090_v19 = vld [vmem:[#allocation20_spill] sm:$0xff] }
  0x8b   :  { %v457_v57 = vadd.f32 %v453_v48, %v425_v17  ;;  %v474_v13 = vmul.f32 %v470_v27, %v466_v32  ;;  %v482_v14 = vmul.f32 %v466_v32, %v466_v32  ;;  %v483_v55 = vmul.f32 %v467_v24, %v467_v24  ;;  %v2091_v1 = vld [vmem:[#allocation21_spill] sm:$0xff]  ;;  %v2092_v32 = vld [vmem:[#allocation22_spill] sm:$0xff] }
  0x8c   :  { %v475_v12 = vmul.f32 %v471_v60, %v467_v24  ;;  %v462_v49 = vadd.f32 %v458_v50, %v430_v18  ;;  %v463_v36 = vadd.f32 %v459_v31, %v431_v15  ;;  %v472_v6 = vsub.f32 %v2085_v46, %v1441_v39  ;;  %v2095_v46 = vld [vmem:[#allocation25_spill] sm:$0xff] }
  0x8d   :  { %v473_v38 = vsub.f32 %v2086_v34, %v1443_v45  ;;  %v464_v10 = vadd.f32 %v460_v4, %v432_v47  ;;  %v465_v35 = vadd.f32 %v461_v51, %v433_v0  ;;  %v484_v63 = vmul.f32 %v468_v8, %v468_v8  ;;  %v2089_v47 = vld [vmem:[#allocation19_spill] sm:$0xff] }
  0x8e   :  { %v485_v11 = vmul.f32 %v469_v7, %v469_v7  ;;  %v476_v40 = vmul.f32 %v472_v6, %v468_v8  ;;  %v498_v17 = vsub.f32 %v2087_v16, %v1429_v37  ;;  %v499_v58 = vsub.f32 %v2088_v59, %v1431_v21  ;;  %v2099_v16 = vld [vmem:[#allocation29_spill] sm:$0xff]  ;;  %v2100_v59 = vld [vmem:[#allocation30_spill] sm:$0xff] }
  0x8f   :  { %v477_v41 = vmul.f32 %v473_v38, %v469_v7  ;;  %v478_v29 = vadd.f32 %v474_v13, %v446_v23  ;;  %v479_v61 = vadd.f32 %v475_v12, %v447_v3  ;;  %v486_v56 = vadd.f32 %v482_v14, %v454_v28 }
  0x90   :  { %v487_v44 = vadd.f32 %v483_v55, %v455_v53  ;;  %v490_v18 = vmul.f32 %v470_v27, %v470_v27  ;;  %v491_v15 = vmul.f32 %v471_v60, %v471_v60  ;;  %v492_v42 = vmul.f32 %v472_v6, %v472_v6 }
  0x91   :  { %v493_v43 = vmul.f32 %v473_v38, %v473_v38  ;;  %v500_v0 = vsub.f32 %v2089_v47, %v1433_v25  ;;  %v501_v48 = vsub.f32 %v2090_v19, %v1435_v52  ;;  %v502_v2 = vsub.f32 %v2091_v1, %v1437_v22  ;;  %v2101_v19 = vld [vmem:[#allocation31_spill] sm:$0xff]  ;;  %v2102_v1 = vld [vmem:[#allocation32_spill] sm:$0xff] }
  0x92   :  { %v503_v24 = vsub.f32 %v2092_v32, %v1439_v62  ;;  %v488_v23 = vadd.f32 %v484_v63, %v456_v33  ;;  %v489_v3 = vadd.f32 %v485_v11, %v457_v57  ;;  %v514_v28 = vmul.f32 %v498_v17, %v498_v17 }
  0x93   :  { %v515_v53 = vmul.f32 %v499_v58, %v499_v58  ;;  %v480_v50 = vadd.f32 %v476_v40, %v448_v54  ;;  %v481_v31 = vadd.f32 %v477_v41, %v449_v20  ;;  %v506_v4 = vmul.f32 %v502_v2, %v498_v17  ;;  %v2098_v40 = vld [vmem:[#allocation28_spill] sm:$0xff] }
  0x94   :  { %v507_v51 = vmul.f32 %v503_v24, %v499_v58  ;;  %v494_v5 = vadd.f32 %v490_v18, %v462_v49  ;;  %v495_v8 = vadd.f32 %v491_v15, %v463_v36  ;;  %v504_v7 = vsub.f32 %v2093_v9, %v1441_v39  ;;  %v2096_v36 = vld [vmem:[#allocation26_spill] sm:$0xff] }
  0x95   :  { %v505_v27 = vsub.f32 %v2094_v26, %v1443_v45  ;;  %v496_v30 = vadd.f32 %v492_v42, %v464_v10  ;;  %v497_v60 = vadd.f32 %v493_v43, %v465_v35  ;;  %v516_v13 = vmul.f32 %v500_v0, %v500_v0  ;;  %v2097_v10 = vld [vmem:[#allocation27_spill] sm:$0xff] }
  0x96   :  { %v517_v12 = vmul.f32 %v501_v48, %v501_v48  ;;  %v508_v33 = vmul.f32 %v504_v7, %v500_v0  ;;  %v518_v14 = vadd.f32 %v514_v28, %v486_v56  ;;  %v519_v55 = vadd.f32 %v515_v53, %v487_v44 }
  0x97   :  { %v509_v57 = vmul.f32 %v505_v27, %v501_v48  ;;  %v510_v54 = vadd.f32 %v506_v4, %v478_v29  ;;  %v511_v20 = vadd.f32 %v507_v51, %v479_v61  ;;  %v530_v49 = vsub.f32 %v2095_v46, %v1429_v37  ;;  %v2104_v4 = vld [vmem:[#allocation34_spill] sm:$0xff]  ;;  %v2107_v46 = vld [vmem:[#allocation37_spill] sm:$0xff] }
  0x98   :  { %v531_v6 = vsub.f32 %v2096_v36, %v1431_v21  ;;  %v522_v34 = vmul.f32 %v502_v2, %v502_v2  ;;  %v523_v38 = vmul.f32 %v503_v24, %v503_v24  ;;  %v524_v63 = vmul.f32 %v504_v7, %v504_v7  ;;  %v2108_v36 = vld [vmem:[#allocation38_spill] sm:$0xff] }
  0x99   :  { %v525_v11 = vmul.f32 %v505_v27, %v505_v27  ;;  %v532_v35 = vsub.f32 %v2097_v10, %v1433_v25  ;;  %v533_v41 = vsub.f32 %v2098_v40, %v1435_v52  ;;  %v534_v17 = vsub.f32 %v2099_v16, %v1437_v22  ;;  %v2109_v40 = vld [vmem:[#allocation39_spill] sm:$0xff]  ;;  %v2110_v16 = vld [vmem:[#allocation40_spill] sm:$0xff] }
  0x9a   :  { %v535_v58 = vsub.f32 %v2100_v59, %v1439_v62  ;;  %v512_v29 = vadd.f32 %v508_v33, %v480_v50  ;;  %v513_v61 = vadd.f32 %v509_v57, %v481_v31  ;;  %v520_v56 = vadd.f32 %v516_v13, %v488_v23  ;;  %v2103_v23 = vld [vmem:[#allocation33_spill] sm:$0xff]  ;;  %v2106_v33 = vld [vmem:[#allocation36_spill] sm:$0xff] }
  0x9b   :  { %v521_v44 = vadd.f32 %v517_v12, %v489_v3  ;;  %v538_v18 = vmul.f32 %v534_v17, %v530_v49  ;;  %v546_v42 = vmul.f32 %v530_v49, %v530_v49  ;;  %v547_v43 = vmul.f32 %v531_v6, %v531_v6 }
  0x9c   :  { %v539_v15 = vmul.f32 %v535_v58, %v531_v6  ;;  %v526_v47 = vadd.f32 %v522_v34, %v494_v5  ;;  %v527_v0 = vadd.f32 %v523_v38, %v495_v8  ;;  %v536_v48 = vsub.f32 %v2101_v19, %v1441_v39  ;;  %v2111_v19 = vld [vmem:[#allocation41_spill] sm:$0xff] }
  0x9d   :  { %v537_v2 = vsub.f32 %v2102_v1, %v1443_v45  ;;  %v528_v32 = vadd.f32 %v524_v63, %v496_v30  ;;  %v529_v24 = vadd.f32 %v525_v11, %v497_v60  ;;  %v548_v28 = vmul.f32 %v532_v35, %v532_v35  ;;  %v2105_v30 = vld [vmem:[#allocation35_spill] sm:$0xff] }
  0x9e   :  { %v549_v53 = vmul.f32 %v533_v41, %v533_v41  ;;  %v540_v50 = vmul.f32 %v536_v48, %v532_v35  ;;  %v562_v3 = vsub.f32 %v2103_v23, %v1429_v37  ;;  %v563_v51 = vsub.f32 %v2104_v4, %v1431_v21  ;;  %v2115_v23 = vld [vmem:[#allocation45_spill] sm:$0xff]  ;;  %v2116_v4 = vld [vmem:[#allocation46_spill] sm:$0xff] }
  0x9f   :  { %v541_v31 = vmul.f32 %v537_v2, %v533_v41  ;;  %v542_v5 = vadd.f32 %v538_v18, %v510_v54  ;;  %v543_v8 = vadd.f32 %v539_v15, %v511_v20  ;;  %v550_v9 = vadd.f32 %v546_v42, %v518_v14 }
  0xa0   :  { %v551_v7 = vadd.f32 %v547_v43, %v519_v55  ;;  %v554_v26 = vmul.f32 %v534_v17, %v534_v17  ;;  %v555_v27 = vmul.f32 %v535_v58, %v535_v58  ;;  %v556_v13 = vmul.f32 %v536_v48, %v536_v48 }
  0xa1   :  { %v557_v12 = vmul.f32 %v537_v2, %v537_v2  ;;  %v564_v60 = vsub.f32 %v2105_v30, %v1433_v25  ;;  %v565_v57 = vsub.f32 %v2106_v33, %v1435_v52  ;;  %v566_v49 = vsub.f32 %v2107_v46, %v1437_v22  ;;  %v2117_v30 = vld [vmem:[#allocation47_spill] sm:$0xff]  ;;  %v2118_v33 = vld [vmem:[#allocation48_spill] sm:$0xff] }
  0xa2   :  { %v567_v6 = vsub.f32 %v2108_v36, %v1439_v62  ;;  %v552_v54 = vadd.f32 %v548_v28, %v520_v56  ;;  %v553_v20 = vadd.f32 %v549_v53, %v521_v44  ;;  %v578_v14 = vmul.f32 %v562_v3, %v562_v3  ;;  %v2113_v28 = vld [vmem:[#allocation43_spill] sm:$0xff] }
  0xa3   :  { %v579_v55 = vmul.f32 %v563_v51, %v563_v51  ;;  %v544_v34 = vadd.f32 %v540_v50, %v512_v29  ;;  %v545_v38 = vadd.f32 %v541_v31, %v513_v61  ;;  %v570_v63 = vmul.f32 %v566_v49, %v562_v3 }
  0xa4   :  { %v571_v11 = vmul.f32 %v567_v6, %v563_v51  ;;  %v558_v10 = vadd.f32 %v554_v26, %v526_v47  ;;  %v559_v35 = vadd.f32 %v555_v27, %v527_v0  ;;  %v568_v41 = vsub.f32 %v2109_v40, %v1441_v39  ;;  %v2112_v0 = vld [vmem:[#allocation42_spill] sm:$0xff] }
  0xa5   :  { %v569_v17 = vsub.f32 %v2110_v16, %v1443_v45  ;;  %v560_v59 = vadd.f32 %v556_v13, %v528_v32  ;;  %v561_v58 = vadd.f32 %v557_v12, %v529_v24  ;;  %v580_v18 = vmul.f32 %v564_v60, %v564_v60  ;;  %v2114_v24 = vld [vmem:[#allocation44_spill] sm:$0xff] }
  0xa6   :  { %v581_v15 = vmul.f32 %v565_v57, %v565_v57  ;;  %v572_v56 = vmul.f32 %v568_v41, %v564_v60  ;;  %v582_v42 = vadd.f32 %v578_v14, %v550_v9  ;;  %v583_v43 = vadd.f32 %v579_v55, %v551_v7 }
  0xa7   :  { %v573_v44 = vmul.f32 %v569_v17, %v565_v57  ;;  %v574_v29 = vadd.f32 %v570_v63, %v542_v5  ;;  %v575_v61 = vadd.f32 %v571_v11, %v543_v8  ;;  %v594_v47 = vsub.f32 %v2111_v19, %v1429_v37  ;;  %v2120_v63 = vld [vmem:[#allocation50_spill] sm:$0xff]  ;;  %v2123_v19 = vld [vmem:[#allocation53_spill] sm:$0xff] }
  0xa8   :  { %v595_v48 = vsub.f32 %v2112_v0, %v1431_v21  ;;  %v586_v1 = vmul.f32 %v566_v49, %v566_v49  ;;  %v587_v2 = vmul.f32 %v567_v6, %v567_v6  ;;  %v596_v32 = vsub.f32 %v2113_v28, %v1433_v25  ;;  %v2124_v0 = vld [vmem:[#allocation54_spill] sm:$0xff]  ;;  %v2126_v28 = vld [vmem:[#allocation56_spill] sm:$0xff] }
  0xa9   :  { %v597_v53 = vsub.f32 %v2114_v24, %v1435_v52  ;;  %v588_v50 = vmul.f32 %v568_v41, %v568_v41  ;;  %v589_v31 = vmul.f32 %v569_v17, %v569_v17  ;;  %v598_v3 = vsub.f32 %v2115_v23, %v1437_v22 }
  0xaa   :  { %v599_v51 = vsub.f32 %v2116_v4, %v1439_v62  ;;  %v576_v5 = vadd.f32 %v572_v56, %v544_v34  ;;  %v577_v8 = vadd.f32 %v573_v44, %v545_v38  ;;  %v584_v9 = vadd.f32 %v580_v18, %v552_v54  ;;  %v2119_v54 = vld [vmem:[#allocation49_spill] sm:$0xff]  ;;  %v2121_v56 = vld [vmem:[#allocation51_spill] sm:$0xff] }
  0xab   :  { %v585_v7 = vadd.f32 %v581_v15, %v553_v20  ;;  %v602_v26 = vmul.f32 %v598_v3, %v594_v47  ;;  %v610_v13 = vmul.f32 %v594_v47, %v594_v47  ;;  %v611_v12 = vmul.f32 %v595_v48, %v595_v48 }
  0xac   :  { %v603_v27 = vmul.f32 %v599_v51, %v595_v48  ;;  %v600_v60 = vsub.f32 %v2117_v30, %v1441_v39  ;;  %v601_v57 = vsub.f32 %v2118_v33, %v1443_v45  ;;  %v612_v46 = vmul.f32 %v596_v32, %v596_v32  ;;  %v2127_v33 = vld [vmem:[#allocation57_spill] sm:$0xff] }
  0xad   :  { %v613_v49 = vmul.f32 %v597_v53, %v597_v53  ;;  %v590_v36 = vadd.f32 %v586_v1, %v558_v10  ;;  %v591_v6 = vadd.f32 %v587_v2, %v559_v35  ;;  %v592_v14 = vadd.f32 %v588_v50, %v560_v59  ;;  %v2122_v35 = vld [vmem:[#allocation52_spill] sm:$0xff]  ;;  %v2125_v1 = vld [vmem:[#allocation55_spill] sm:$0xff] }
  0xae   :  { %v593_v55 = vadd.f32 %v589_v31, %v561_v58  ;;  %v604_v34 = vmul.f32 %v600_v60, %v596_v32  ;;  %v605_v38 = vmul.f32 %v601_v57, %v597_v53  ;;  %v626_v20 = vsub.f32 %v2119_v54, %v1429_v37  ;;  %v2129_v54 = vld [vmem:[#allocation59_spill] sm:$0xff] }
  0xaf   :  { %v627_v11 = vsub.f32 %v2120_v63, %v1431_v21  ;;  %v606_v40 = vadd.f32 %v602_v26, %v574_v29  ;;  %v607_v41 = vadd.f32 %v603_v27, %v575_v61  ;;  %v614_v16 = vadd.f32 %v610_v13, %v582_v42 }
  0xb0   :  { %v615_v17 = vadd.f32 %v611_v12, %v583_v43  ;;  %v616_v18 = vadd.f32 %v612_v46, %v584_v9  ;;  %v617_v15 = vadd.f32 %v613_v49, %v585_v7  ;;  %v628_v10 = vsub.f32 %v2121_v56, %v1433_v25  ;;  %v2128_v46 = vld [vmem:[#allocation58_spill] sm:$0xff]  ;;  %v2134_v56 = vld [vmem:[#allocation64_spill] sm:$0xff] }
  0xb1   :  { %v629_v59 = vsub.f32 %v2122_v35, %v1435_v52  ;;  %v618_v58 = vmul.f32 %v598_v3, %v598_v3  ;;  %v619_v44 = vmul.f32 %v599_v51, %v599_v51  ;;  %v630_v47 = vsub.f32 %v2123_v19, %v1437_v22 }
  0xb2   :  { %v631_v48 = vsub.f32 %v2124_v0, %v1439_v62  ;;  %v620_v29 = vmul.f32 %v600_v60, %v600_v60  ;;  %v621_v61 = vmul.f32 %v601_v57, %v601_v57  ;;  %v642_v42 = vmul.f32 %v626_v20, %v626_v20 }
  0xb3   :  { %v643_v43 = vmul.f32 %v627_v11, %v627_v11  ;;  %v632_v2 = vsub.f32 %v2125_v1, %v1441_v39  ;;  %v633_v32 = vsub.f32 %v2126_v28, %v1443_v45  ;;  %v634_v24 = vmul.f32 %v630_v47, %v626_v20 }
  0xb4   :  { %v635_v53 = vmul.f32 %v631_v48, %v627_v11  ;;  %v608_v50 = vadd.f32 %v604_v34, %v576_v5  ;;  %v609_v31 = vadd.f32 %v605_v38, %v577_v8  ;;  %v644_v23 = vmul.f32 %v628_v10, %v628_v10 }
  0xb5   :  { %v645_v3 = vmul.f32 %v629_v59, %v629_v59  ;;  %v622_v4 = vadd.f32 %v618_v58, %v590_v36  ;;  %v623_v51 = vadd.f32 %v619_v44, %v591_v6  ;;  %v636_v9 = vmul.f32 %v632_v2, %v628_v10 }
  0xb6   :  { %v637_v7 = vmul.f32 %v633_v32, %v629_v59  ;;  %v624_v26 = vadd.f32 %v620_v29, %v592_v14  ;;  %v625_v27 = vadd.f32 %v621_v61, %v593_v55  ;;  %v646_v13 = vadd.f32 %v642_v42, %v614_v16  ;;  %v2130_v55 = vld [vmem:[#allocation60_spill] sm:$0xff]  ;;  %v2132_v16 = vld [vmem:[#allocation62_spill] sm:$0xff] }
  0xb7   :  { %v647_v12 = vadd.f32 %v643_v43, %v615_v17  ;;  %v638_v30 = vadd.f32 %v634_v24, %v606_v40  ;;  %v639_v60 = vadd.f32 %v635_v53, %v607_v41  ;;  %v658_v57 = vsub.f32 %v2127_v33, %v1429_v37  ;;  %v2131_v40 = vld [vmem:[#allocation61_spill] sm:$0xff] }
  0xb8   :  { %v659_v49 = vsub.f32 %v2128_v46, %v1431_v21  ;;  %v648_v5 = vadd.f32 %v644_v23, %v616_v18  ;;  %v649_v8 = vadd.f32 %v645_v3, %v617_v15  ;;  %v650_v34 = vmul.f32 %v630_v47, %v630_v47  ;;  %v2133_v18 = vld [vmem:[#allocation63_spill] sm:$0xff]  ;;  %v2135_v24 = vld [vmem:[#allocation65_spill] sm:$0xff]  ;;  %v2138_v46 = vld [vmem:[#allocation68_spill] sm:$0xff] }
  0xb9   :  { %v651_v38 = vmul.f32 %v631_v48, %v631_v48  ;;  %v640_v36 = vadd.f32 %v636_v9, %v608_v50  ;;  %v641_v6 = vadd.f32 %v637_v7, %v609_v31  ;;  %v660_v14 = vsub.f32 %v2129_v54, %v1433_v25  ;;  %v2136_v50 = vld [vmem:[#allocation66_spill] sm:$0xff] }
  0xba   :  { %v661_v20 = vsub.f32 %v2130_v55, %v1435_v52  ;;  %v652_v63 = vmul.f32 %v632_v2, %v632_v2  ;;  %v653_v11 = vmul.f32 %v633_v32, %v633_v32  ;;  %v662_v41 = vsub.f32 %v2131_v40, %v1437_v22  ;;  %v2142_v55 = vld [vmem:[#allocation72_spill] sm:$0xff]  ;;  %v2143_v40 = vld [vmem:[#allocation73_spill] sm:$0xff] }
  0xbb   :  { %v663_v17 = vsub.f32 %v2132_v16, %v1439_v62  ;;  %v664_v15 = vsub.f32 %v2133_v18, %v1441_v39  ;;  %v665_v10 = vsub.f32 %v2134_v56, %v1443_v45  ;;  %v674_v35 = vmul.f32 %v658_v57, %v658_v57  ;;  %v2144_v16 = vld [vmem:[#allocation74_spill] sm:$0xff] }
  0xbc   :  { %v675_v59 = vmul.f32 %v659_v49, %v659_v49  ;;  %v654_v58 = vadd.f32 %v650_v34, %v622_v4  ;;  %v655_v44 = vadd.f32 %v651_v38, %v623_v51  ;;  %v666_v19 = vmul.f32 %v662_v41, %v658_v57  ;;  %v2139_v34 = vld [vmem:[#allocation69_spill] sm:$0xff] }
  0xbd   :  { %v667_v47 = vmul.f32 %v663_v17, %v659_v49  ;;  %v668_v0 = vmul.f32 %v664_v15, %v660_v14  ;;  %v669_v48 = vmul.f32 %v665_v10, %v661_v20  ;;  %v676_v29 = vmul.f32 %v660_v14, %v660_v14 }
  0xbe   :  { %v677_v61 = vmul.f32 %v661_v20, %v661_v20  ;;  %v656_v42 = vadd.f32 %v652_v63, %v624_v26  ;;  %v657_v43 = vadd.f32 %v653_v11, %v625_v27  ;;  %v682_v1 = vmul.f32 %v662_v41, %v662_v41 }
  0xbf   :  { %v683_v2 = vmul.f32 %v663_v17, %v663_v17  ;;  %v678_v28 = vadd.f32 %v674_v35, %v646_v13  ;;  %v679_v32 = vadd.f32 %v675_v59, %v647_v12  ;;  %v690_v53 = vsub.f32 %v2135_v24, %v1429_v37  ;;  %v2137_v13 = vld [vmem:[#allocation67_spill] sm:$0xff]  ;;  %v2147_v24 = vld [vmem:[#allocation77_spill] sm:$0xff] }
  0xc0   :  { %v691_v31 = vsub.f32 %v2136_v50, %v1431_v21  ;;  %v670_v23 = vadd.f32 %v666_v19, %v638_v30  ;;  %v671_v3 = vadd.f32 %v667_v47, %v639_v60  ;;  %v684_v4 = vmul.f32 %v664_v15, %v664_v15  ;;  %v2140_v60 = vld [vmem:[#allocation70_spill] sm:$0xff]  ;;  %v2146_v19 = vld [vmem:[#allocation76_spill] sm:$0xff] }
  0xc1   :  { %v685_v51 = vmul.f32 %v665_v10, %v665_v10  ;;  %v1625_v9 = vadd.f32 %v668_v0, %v640_v36  ;;  %v1627_v7 = vadd.f32 %v669_v48, %v641_v6  ;;  %v680_v26 = vadd.f32 %v676_v29, %v648_v5  ;;  %v2141_v5 = vld [vmem:[#allocation71_spill] sm:$0xff]  ;;  %v2148_v50 = vld [vmem:[#allocation78_spill] sm:$0xff] }
  0xc2   :  { %v681_v27 = vadd.f32 %v677_v61, %v649_v8  ;;  %v686_v33 = vadd.f32 %v682_v1, %v654_v58  ;;  %v687_v57 = vadd.f32 %v683_v2, %v655_v44  ;;  %v692_v12 = vsub.f32 %v2137_v13, %v1433_v25  ;;  %v2145_v58 = vld [vmem:[#allocation75_spill] sm:$0xff] }
  0xc3   :  { %v693_v49 = vsub.f32 %v2138_v46, %v1435_v52  ;;  %v694_v30 = vsub.f32 %v2139_v34, %v1437_v22  ;;  %v695_v38 = vsub.f32 %v2140_v60, %v1439_v62  ;;  %v706_v36 = vmul.f32 %v690_v53, %v690_v53  ;;  %v2151_v60 = vld [vmem:[#allocation81_spill] sm:$0xff] }
  0xc4   :  { %v707_v54 = vmul.f32 %v691_v31, %v691_v31  ;;  %v688_v6 = vadd.f32 %v684_v4, %v656_v42  ;;  %v689_v14 = vadd.f32 %v685_v51, %v657_v43  ;;  %v696_v8 = vsub.f32 %v2141_v5, %v1441_v39  ;;  %v2150_v4 = vld [vmem:[#allocation80_spill] sm:$0xff] }
  0xc5   :  { %v697_v20 = vsub.f32 %v2142_v55, %v1443_v45  ;;  %v698_v63 = vmul.f32 %v694_v30, %v690_v53  ;;  %v699_v11 = vmul.f32 %v695_v38, %v691_v31  ;;  %v1643_v41 = vsub.f32 %v2143_v40, %v1429_v37  ;;  %v2155_v40 = vld [vmem:[#allocation85_spill] sm:$0xff] }
  0xc6   :  { %v1647_v17 = vsub.f32 %v2144_v16, %v1431_v21  ;;  %v1649_v18 = vmul.f32 %v696_v8, %v692_v12  ;;  %v708_v56 = vmul.f32 %v692_v12, %v692_v12  ;;  %v709_v10 = vmul.f32 %v693_v49, %v693_v49 }
  0xc7   :  { %v1651_v15 = vmul.f32 %v697_v20, %v693_v49  ;;  %v710_v35 = vadd.f32 %v706_v36, %v678_v28  ;;  %v711_v59 = vadd.f32 %v707_v54, %v679_v32  ;;  %v1655_v44 = vsub.f32 %v2145_v58, %v1433_v25  ;;  %v2152_v36 = vld [vmem:[#allocation82_spill] sm:$0xff]  ;;  %v2158_v58 = vld [vmem:[#allocation88_spill] sm:$0xff] }
  0xc8   :  { %v1659_v47 = vsub.f32 %v2146_v19, %v1435_v52  ;;  %v714_v0 = vmul.f32 %v694_v30, %v694_v30  ;;  %v715_v48 = vmul.f32 %v695_v38, %v695_v38  ;;  %v716_v29 = vmul.f32 %v696_v8, %v696_v8 }
  0xc9   :  { %v717_v61 = vmul.f32 %v697_v20, %v697_v20  ;;  %v1661_v42 = vadd.f32 %v698_v63, %v670_v23  ;;  %v1663_v43 = vadd.f32 %v699_v11, %v671_v3  ;;  %v738_v1 = vmul.f32 %v1643_v41, %v1643_v41  ;;  %v2149_v23 = vld [vmem:[#allocation79_spill] sm:$0xff] }
  0xca   :  { %v739_v2 = vmul.f32 %v1647_v17, %v1647_v17  ;;  %v712_v28 = vadd.f32 %v708_v56, %v680_v26  ;;  %v713_v32 = vadd.f32 %v709_v10, %v681_v27  ;;  %v1671_v53 = vsub.f32 %v2147_v24, %v1437_v22  ;;  %v2156_v56 = vld [vmem:[#allocation86_spill] sm:$0xff] }
  0xcb   :  { %v1675_v31 = vsub.f32 %v2148_v50, %v1439_v62  ;;  %v1679_v3 = vsub.f32 %v2149_v23, %v1441_v39  ;;  %v1683_v51 = vsub.f32 %v2150_v4, %v1443_v45  ;;  %v740_v26 = vmul.f32 %v1655_v44, %v1655_v44 }
  0xcc   :  { %v741_v27 = vmul.f32 %v1659_v47, %v1659_v47  ;;  %v718_v13 = vadd.f32 %v714_v0, %v686_v33  ;;  %v719_v12 = vadd.f32 %v715_v48, %v687_v57  ;;  %v720_v46 = vadd.f32 %v716_v29, %v688_v6  ;;  %v2153_v33 = vld [vmem:[#allocation83_spill] sm:$0xff]  ;;  %v2154_v6 = vld [vmem:[#allocation84_spill] sm:$0xff]  ;;  %v2159_v29 = vld [vmem:[#allocation89_spill] sm:$0xff] }
  0xcd   :  { %v721_v49 = vadd.f32 %v717_v61, %v689_v14  ;;  %v742_v34 = vadd.f32 %v738_v1, %v710_v35  ;;  %v743_v30 = vadd.f32 %v739_v2, %v711_v59  ;;  %v1691_v38 = vsub.f32 %v2151_v60, %v1429_v37  ;;  %v2157_v35 = vld [vmem:[#allocation87_spill] sm:$0xff]  ;;  %v2160_v1 = vld [vmem:[#allocation90_spill] sm:$0xff]  ;;  %v2163_v60 = vld [vmem:[#allocation92_spill] sm:$0xff] }
  0xce   :  { %v1695_v54 = vsub.f32 %v2152_v36, %v1431_v21  ;;  %v746_v5 = vmul.f32 %v1671_v53, %v1671_v53  ;;  %v747_v8 = vmul.f32 %v1675_v31, %v1675_v31  ;;  %v1703_v57 = vsub.f32 %v2153_v33, %v1433_v25 }
  0xcf   :  { %v1707_v14 = vsub.f32 %v2154_v6, %v1435_v52  ;;  %v744_v55 = vadd.f32 %v740_v26, %v712_v28  ;;  %v745_v20 = vadd.f32 %v741_v27, %v713_v32  ;;  %v748_v63 = vmul.f32 %v1679_v3, %v1679_v3  ;;  %v2161_v26 = vld [vmem:[#allocation91_spill] sm:$0xff] }
  0xd0   :  { %v749_v11 = vmul.f32 %v1683_v51, %v1683_v51  ;;  %v1715_v16 = vsub.f32 %v2155_v40, %v1437_v22  ;;  %v1719_v10 = vsub.f32 %v2156_v56, %v1439_v62  ;;  %v1723_v59 = vsub.f32 %v2157_v35, %v1441_v39  ;;  %v2165_v40 = vld [vmem:[#allocation93_spill] sm:$0xff]  ;;  %v2166_v35 = vld [vmem:[#allocation94_spill] sm:$0xff] }
  0xd1   :  { %v1727_v19 = vsub.f32 %v2158_v58, %v1443_v45  ;;  %v770_v0 = vmul.f32 %v1691_v38, %v1691_v38  ;;  %v771_v48 = vmul.f32 %v1695_v54, %v1695_v54  ;;  %v1735_v61 = vsub.f32 %v2159_v29, %v1429_v37  ;;  %v2167_v29 = vld [vmem:[#allocation95_spill] sm:$0xff] }
  0xd2   :  { %v1739_v2 = vsub.f32 %v2160_v1, %v1431_v21  ;;  %v750_v28 = vadd.f32 %v746_v5, %v718_v13  ;;  %v751_v32 = vadd.f32 %v747_v8, %v719_v12  ;;  %v772_v24 = vmul.f32 %v1703_v57, %v1703_v57 }
  0xd3   :  { %v773_v50 = vmul.f32 %v1707_v14, %v1707_v14  ;;  %v752_v23 = vadd.f32 %v748_v63, %v720_v46  ;;  %v753_v4 = vadd.f32 %v749_v11, %v721_v49  ;;  %v1747_v27 = vsub.f32 %v2161_v26, %v1433_v25 }
  0xd4   :  { %v1751_v36 = vsub.f32 %v2163_v60, %v1435_v52  ;;  %v778_v13 = vmul.f32 %v1715_v16, %v1715_v16  ;;  %v779_v12 = vmul.f32 %v1719_v10, %v1719_v10  ;;  %v780_v5 = vmul.f32 %v1723_v59, %v1723_v59 }
  0xd5   :  { %2162 = vst [vmem:[#allocation11_spill] sm:$0xff] %v1747_v27  ;;  %v781_v46 = vmul.f32 %v1727_v19, %v1727_v19  ;;  %v774_v49 = vadd.f32 %v770_v0, %v742_v34  ;;  %v775_v8 = vadd.f32 %v771_v48, %v743_v30  ;;  %v802_v33 = vmul.f32 %v1735_v61, %v1735_v61  ;;  %v2168_v30 = vld [vmem:[#allocation96_spill] sm:$0xff] }
  0xd6   :  { %2164 = vst [vmem:[#allocation12_spill] sm:$0xff] %v1751_v36  ;;  %v803_v6 = vmul.f32 %v1739_v2, %v1739_v2  ;;  %v776_v63 = vadd.f32 %v772_v24, %v744_v55  ;;  %v777_v11 = vadd.f32 %v773_v50, %v745_v20  ;;  %v1767_v56 = vsub.f32 %v2165_v40, %v1437_v22  ;;  %v2169_v40 = vld [vmem:[#allocation97_spill] sm:$0xff] }
  0xd7   :  { %v1771_v58 = vsub.f32 %v2166_v35, %v1439_v62  ;;  %v1775_v34 = vsub.f32 %v2167_v29, %v1441_v39  ;;  %v1779_v0 = vsub.f32 %v2168_v30, %v1443_v45  ;;  %v804_v55 = vmul.f32 %v1747_v27, %v1747_v27  ;;  %v2170_v29 = vld [vmem:[#allocation98_spill] sm:$0xff] }
  0xd8   :  { %v805_v20 = vmul.f32 %v1751_v36, %v1751_v36  ;;  %v782_v48 = vadd.f32 %v778_v13, %v750_v28  ;;  %v783_v1 = vadd.f32 %v779_v12, %v751_v32  ;;  %v784_v24 = vadd.f32 %v780_v5, %v752_v23  ;;  %v2171_v28 = vld [vmem:[#allocation99_spill] sm:$0xff]  ;;  %v2172_v23 = vld [vmem:[#allocation100_spill] sm:$0xff]  ;;  %v2174_v5 = vld [vmem:[#allocation101_spill] sm:$0xff] }
  0xd9   :  { %v785_v50 = vadd.f32 %v781_v46, %v753_v4  ;;  %v806_v26 = vadd.f32 %v802_v33, %v774_v49  ;;  %v807_v60 = vadd.f32 %v803_v6, %v775_v8  ;;  %v1787_v35 = vsub.f32 %v2169_v40, %v1429_v37  ;;  %v2175_v49 = vld [vmem:[#allocation102_spill] sm:$0xff]  ;;  %v2176_v33 = vld [vmem:[#allocation103_spill] sm:$0xff] }
  0xda   :  { %v1791_v30 = vsub.f32 %v2170_v29, %v1431_v21  ;;  %v810_v27 = vmul.f32 %v1767_v56, %v1767_v56  ;;  %v811_v36 = vmul.f32 %v1771_v58, %v1771_v58  ;;  %v1799_v32 = vsub.f32 %v2171_v28, %v1433_v25 }
  0xdb   :  { %v1803_v4 = vsub.f32 %v2172_v23, %v1435_v52  ;;  %v808_v37 = vadd.f32 %v804_v55, %v776_v63  ;;  %v809_v13 = vadd.f32 %v805_v20, %v777_v11  ;;  %v812_v21 = vmul.f32 %v1775_v34, %v1775_v34  ;;  %v2177_v63 = vld [vmem:[#allocation104_spill] sm:$0xff] }
  0xdc   :  { %v813_v12 = vmul.f32 %v1779_v0, %v1779_v0  ;;  %v822_v46 = vsub.f32 %v2174_v5, %v1437_v22  ;;  %v1813_v8 = vsub.f32 %v2175_v49, %v1439_v62  ;;  %v834_v25 = vmul.f32 %v1787_v35, %v1787_v35 }
  0xdd   :  { %2173 = vst [vmem:[#allocation13_spill] sm:$0xff] %v1803_v4  ;;  %v835_v52 = vmul.f32 %v1791_v30, %v1791_v30  ;;  %v824_v6 = vsub.f32 %v2176_v33, %v1441_v39  ;;  %v1823_v11 = vsub.f32 %v2177_v63, %v1443_v45  ;;  %v836_v22 = vmul.f32 %v1799_v32, %v1799_v32 }
  0xde   :  { %v837_v62 = vmul.f32 %v1803_v4, %v1803_v4  ;;  %v704_v55 = vadd.f32 %v1649_v18, %v1625_v9  ;;  %v730_v20 = vmul.f32 %v1671_v53, %v1643_v41  ;;  %v814_v40 = vadd.f32 %v810_v27, %v782_v48 }
  0xdf   :  { %v815_v29 = vadd.f32 %v811_v36, %v783_v1  ;;  %v731_v39 = vmul.f32 %v1675_v31, %v1647_v17  ;;  %v732_v45 = vmul.f32 %v1679_v3, %v1655_v44  ;;  %v816_v28 = vadd.f32 %v812_v21, %v784_v24 }
  0xe0   :  { %v817_v23 = vadd.f32 %v813_v12, %v785_v50  ;;  %v838_v5 = vadd.f32 %v834_v25, %v806_v26  ;;  %v839_v49 = vadd.f32 %v835_v52, %v807_v60  ;;  %v842_v33 = vmul.f32 %v822_v46, %v822_v46 }
  0xe1   :  { %v843_v63 = vmul.f32 %v1813_v8, %v1813_v8  ;;  %v840_v9 = vadd.f32 %v836_v22, %v808_v37  ;;  %v841_v18 = vadd.f32 %v837_v62, %v809_v13  ;;  %v844_v4 = vmul.f32 %v824_v6, %v824_v6  ;;  %v2179_v37 = vld [vmem:[#allocation12_spill] sm:$0xff] }
  0xe2   :  { %v845_v41 = vmul.f32 %v1823_v11, %v1823_v11  ;;  %v705_v17 = vadd.f32 %v1651_v15, %v1627_v7  ;;  %v733_v44 = vmul.f32 %v1683_v51, %v1659_v47  ;;  %v846_v53 = vadd.f32 %v842_v33, %v814_v40 }
  0xe3   :  { %v847_v31 = vadd.f32 %v843_v63, %v815_v29  ;;  %v734_v3 = vadd.f32 %v730_v20, %v1661_v42  ;;  %v735_v27 = vadd.f32 %v731_v39, %v1663_v43  ;;  %v848_v36 = vadd.f32 %v844_v4, %v816_v28 }
  0xe4   :  { %v849_v48 = vadd.f32 %v845_v41, %v817_v23  ;;  %v736_v1 = vadd.f32 %v732_v45, %v704_v55  ;;  %v762_v24 = vmul.f32 %v1715_v16, %v1691_v38  ;;  %v850_v50 = vmul.f32 %v846_v53, %v838_v5 }
  0xe5   :  { %v851_v26 = vmul.f32 %v847_v31, %v839_v49  ;;  %v763_v7 = vmul.f32 %v1719_v10, %v1695_v54  ;;  %v764_v15 = vmul.f32 %v1723_v59, %v1703_v57  ;;  %v852_v47 = vmul.f32 %v848_v36, %v840_v9  ;;  %v2178_v10 = vld [vmem:[#allocation11_spill] sm:$0xff] }
  0xe6   :  { %v853_v51 = vmul.f32 %v849_v48, %v841_v18  ;;  %v737_v60 = vadd.f32 %v733_v44, %v705_v17  ;;  %v765_v42 = vmul.f32 %v1727_v19, %v1707_v14  ;;  %927 = vrsqrt.f32 %v850_v50 }
  0xe7   :  { %929 = vrsqrt.f32 %v851_v26  ;;  %v766_v43 = vadd.f32 %v762_v24, %v734_v3  ;;  %v794_v38 = vmul.f32 %v1767_v56, %v1735_v61  ;;  %v767_v16 = vadd.f32 %v763_v7, %v735_v27 }
  0xe8   :  { %931 = vrsqrt.f32 %v852_v47  ;;  %v768_v4 = vadd.f32 %v764_v15, %v736_v1  ;;  %v769_v54 = vadd.f32 %v765_v42, %v737_v60  ;;  %v795_v57 = vmul.f32 %v1771_v58, %v1739_v2 }
  0xe9   :  { %933 = vrsqrt.f32 %v853_v51  ;;  %v796_v59 = vmul.f32 %v1775_v34, %v2178_v10  ;;  %v797_v14 = vmul.f32 %v1779_v0, %v2179_v37  ;;  %v798_v13 = vadd.f32 %v794_v38, %v766_v43  ;;  %v2180_v0 = vld [vmem:[#allocation13_spill] sm:$0xff] }
  0xea   :  { %v826_v21 = vmul.f32 %v822_v46, %v1787_v35  ;;  %v799_v25 = vadd.f32 %v795_v57, %v767_v16  ;;  %v827_v2 = vmul.f32 %v1813_v8, %v1791_v30  ;;  %v828_v58 = vmul.f32 %v824_v6, %v1799_v32 }
  0xeb   :  { %v800_v52 = vadd.f32 %v796_v59, %v768_v4  ;;  %v801_v22 = vadd.f32 %v797_v14, %v769_v54  ;;  %v829_v40 = vmul.f32 %v1823_v11, %v2180_v0  ;;  %vm860_vm0 = vweird.f32 %v850_v50 }
  0xec   :  { %v928_v19 = vpop.eup %927  ;;  %v830_v29 = vadd.f32 %v826_v21, %v798_v13  ;;  %vm870_vm2 = vweird.f32 %v851_v26  ;;  %vm880_vm4 = vweird.f32 %v852_v47  ;;  %vm890_vm7 = vweird.f32 %v853_v51 }
  0xed   :  { %v930_v12 = vpop.eup %929  ;;  %v855_v61 = vmul.f32 %v928_v19, %v850_v50  ;;  %vm861_vm1 = vweird.f32 %v928_v19  ;;  %v831_v11 = vadd.f32 %v827_v2, %v799_v25  ;;  %v832_v9 = vadd.f32 %v828_v58, %v800_v52 }
  0xee   :  { %v932_v56 = vpop.eup %931  ;;  %v865_v62 = vmul.f32 %v930_v12, %v851_v26  ;;  %vm871_vm3 = vweird.f32 %v930_v12  ;;  %vm1869_vm6 = vmor %vm860_vm0, %vm861_vm1  ;;  %v833_v17 = vadd.f32 %v829_v40, %v801_v22 }
  0xef   :  { %v934_v55 = vpop.eup %933  ;;  %v856_v34 = vmul.f32 %v928_v19, %v855_v61  ;;  %v875_v20 = vmul.f32 %v932_v56, %v852_v47  ;;  %vm881_vm5 = vweird.f32 %v932_v56  ;;  %vm1873_vm9 = vmor %vm870_vm2, %vm871_vm3 }
  0xf0   :  { %v866_v35 = vmul.f32 %v930_v12, %v865_v62  ;;  %v885_v46 = vmul.f32 %v934_v55, %v853_v51  ;;  %vm891_vm8 = vweird.f32 %v934_v55  ;;  %vm882_vm10 = vmor %vm880_vm4, %vm881_vm5 }
  0xf1   :  { %v857_v39 = vmul.f32 0.5, %v856_v34  ;;  %v876_v45 = vmul.f32 %v932_v56, %v875_v20  ;;  %vm892_vm11 = vmor %vm890_vm7, %vm891_vm8 }
  0xf2   :  { %v867_v28 = vmul.f32 0.5, %v866_v35  ;;  %v886_v23 = vmul.f32 %v934_v55, %v885_v46 }
  0xf3   :  { %v858_v5 = vsub.f32 1.5, %v857_v39  ;;  %v877_v30 = vmul.f32 0.5, %v876_v45 }
  0xf4   :  { %v868_v8 = vsub.f32 1.5, %v867_v28  ;;  %v887_v6 = vmul.f32 0.5, %v886_v23 }
  0xf5   :  { %v859_v49 = vmul.f32 %v928_v19, %v858_v5  ;;  %v878_v63 = vsub.f32 1.5, %v877_v30 }
  0xf6   :  { %v869_v18 = vmul.f32 %v930_v12, %v868_v8  ;;  %v888_v41 = vsub.f32 1.5, %v887_v6 }
  0xf7   :  { %v863_v44 = vsel %vm1869_vm6, %v928_v19, %v859_v49  ;;  %v879_v53 = vmul.f32 %v932_v56, %v878_v63 }
  0xf8   :  { %v873_v31 = vsel %vm1873_vm9, %v930_v12, %v869_v18  ;;  %v889_v3 = vmul.f32 %v934_v55, %v888_v41  ;;  %v894_v27 = vmul.f32 %v863_v44, %v830_v29 }
  0xf9   :  { %v883_v36 = vsel %vm882_vm10, %v932_v56, %v879_v53  ;;  %v895_v48 = vmul.f32 %v873_v31, %v831_v11 }
  0xfa   :  { %v893_v1 = vsel %vm892_vm11, %v934_v55, %v889_v3  ;;  %v896_v24 = vmul.f32 %v883_v36, %v832_v9  ;;  %898 = vst [vmem:[#allocation7] sm:$0xff] %v894_v27 }
  0xfb   :  { %v897_v50 = vmul.f32 %v893_v1, %v833_v17  ;;  %899 = vst [vmem:[#allocation7 + $0x8] sm:$0xff] %v895_v48 }
  0xfc   :  { %900 = vst [vmem:[#allocation7 + $0x10] sm:$0xff] %v896_v24 }
  0xfd   :  { %901 = vst [vmem:[#allocation7 + $0x18] sm:$0xff] %v897_v50 }
  0xfe   :  { %914 = dma.vmem_to_hbm [thread:$0]  %s907_s1, 512, %s909_s23, [#allocation4], %s1014_s17, %s1014_s17, %s1015_s18  }
  0xff   :  { %1011 = dma.done.wait [#allocation4], 512  }
 0x100   :  { %1012 = vsyncadd [#allocation4], 4294966784 }
 0x101   :  { %919 = vsyncpa [#allocation3], 1 }
 0x102   :  { %920 = vsyncpa [#allocation6], 1 }
 0x103   :  { %921 = vsyncpa [#allocation4], 1 }

</bundles_post_ra>
